<compile_context>
chip_gen: v6e
topology: v6e:2x2x1
jax: 0.10.0
libtpu: 0.0.40
codegen_flags: <defaults>
</compile_context>

<pallas_src>
import math

import jax
import jax.numpy as jnp
import numpy as np
from jax.experimental import pallas as pl
from jax.experimental.pallas import tpu as pltpu


def gru_encoder_kernel(x_ref, mask_ref, wih_ref, whh_ref, bx_ref, bhn_ref,
                       out_ref, h_ref, gxr_ref, gxz_ref, gxn_ref):
  """Masked GRU recurrence with the input projection hoisted out of the loop.

  x_ref:    (T*B, D) f32   embedded tokens, row = t*B + b (time-major flat)
  mask_ref: (T*B, 1) f32   1.0 while t < lengths[b], else 0.0
  wih_ref:  (3, D, D) f32  input->hidden weights, gate-major (r|z|n), x @ W
  whh_ref:  (3, D, D) f32  hidden->hidden weights, gate-major, h @ W
  bx_ref:   (3, 1, D) f32  b_ih (with b_hh folded in for r and z)
  bhn_ref:  (1, D)   f32   b_hh of the n gate (must stay inside r * (.))
  out_ref:  (T*B, D) f32   per-step hidden states (zeroed past the length)
  h_ref:    (B, D)   f32   hidden at the last valid timestep of each sequence
  gx*_ref:  (T*B, D) f32   VMEM scratch for the hoisted per-gate projections
  """
  TB, D = x_ref.shape
  B = h_ref.shape[0]
  T = TB // B

  # ---- Hoisted phase: input projection for every timestep in one shot -----
  # Three (T*B, D) x (D, D) GEMMs (gate-major keeps the recurrence free of
  # intra-vreg lane slicing).  Biases are added here, outside the loop.
  x = x_ref[...]
  gxr_ref[...] = jnp.dot(x, wih_ref[0],
                         preferred_element_type=jnp.float32) + bx_ref[0]
  gxz_ref[...] = jnp.dot(x, wih_ref[1],
                         preferred_element_type=jnp.float32) + bx_ref[1]
  gxn_ref[...] = jnp.dot(x, wih_ref[2],
                         preferred_element_type=jnp.float32) + bx_ref[2]

  # Hoist recurrent weights / bias loads out of the time loop.
  whh_r = whh_ref[0]
  whh_z = whh_ref[1]
  whh_n = whh_ref[2]
  bhn = bhn_ref[...]                       # (1, D)

  # ---- Serial recurrence: only h @ W_hh depends on the previous step ------
  def step(t, h):
    row = pl.multiple_of(t * B, B)
    gx_r = gxr_ref[pl.ds(row, B), :]       # (B, D) contiguous rows
    gx_z = gxz_ref[pl.ds(row, B), :]
    gx_n = gxn_ref[pl.ds(row, B), :]
    m_t = mask_ref[pl.ds(row, B), :]       # (B, 1)

    gh_r = jnp.dot(h, whh_r, preferred_element_type=jnp.float32)
    gh_z = jnp.dot(h, whh_z, preferred_element_type=jnp.float32)
    gh_n = jnp.dot(h, whh_n, preferred_element_type=jnp.float32) + bhn

    r = jax.nn.sigmoid(gx_r + gh_r)
    z = jax.nn.sigmoid(gx_z + gh_z)
    n = jnp.tanh(gx_n + r * gh_n)
    h_new = (1.0 - z) * n + z * h          # (B, D)

    out_ref[pl.ds(row, B), :] = h_new      # zero-masked once after the loop
    return jnp.where(m_t > 0.5, h_new, h)  # freeze h past the sequence end

  h_final = jax.lax.fori_loop(0, T, step, jnp.zeros((B, D), jnp.float32),
                              unroll=True)
  h_ref[...] = h_final

  # Deferred padding mask: one vectorised multiply instead of T small selects.
  out_ref[...] = out_ref[...] * mask_ref[...]


@jax.jit
def encoder_forward(words, lengths, emb, w_ih, w_hh, b_ih, b_hh):
  """words: (B, T) int32, lengths: (B,) int32 -> (out (B,T,D), h (B,D))."""
  B, T = words.shape
  V, D = emb.shape

  # Embedding lookup as an XLA gather (padding row 0 of `emb` is zero).
  x = jnp.take(emb.astype(jnp.float32), words.astype(jnp.int32), axis=0)
  # Time-major flat layout: row index = t*B + b.
  x_flat = jnp.transpose(x, (1, 0, 2)).reshape(T * B, D)

  # Validity mask in the same row layout (control metadata, not compute).
  mask = (jnp.arange(T)[:, None] < lengths[None, :]).astype(jnp.float32)
  mask_flat = mask.reshape(T * B, 1)

  # Gate-major weights (r|z|n), pre-transposed so the kernel computes x @ W.
  wih_g = jnp.transpose(w_ih.reshape(3, D, D), (0, 2, 1)).astype(jnp.float32)
  whh_g = jnp.transpose(w_hh.reshape(3, D, D), (0, 2, 1)).astype(jnp.float32)
  # Fold b_hh into the hoisted projection for r and z; keep b_hh_n separate
  # (it sits inside the r * (h @ W_hn + b_hn) term).
  b_ih3 = b_ih.reshape(3, 1, D).astype(jnp.float32)
  b_hh3 = b_hh.reshape(3, 1, D).astype(jnp.float32)
  bx_g = jnp.concatenate([b_ih3[0:2] + b_hh3[0:2], b_ih3[2:3]], axis=0)
  bhn = b_hh3[2, :, :]                                       # (1, D)

  vmem = pl.BlockSpec(memory_space=pltpu.MemorySpace.VMEM)
  out_flat, h = pl.pallas_call(
      gru_encoder_kernel,
      out_shape=(jax.ShapeDtypeStruct((T * B, D), jnp.float32),
                 jax.ShapeDtypeStruct((B, D), jnp.float32)),
      in_specs=[vmem, vmem, vmem, vmem, vmem, vmem],
      out_specs=(vmem, vmem),
      scratch_shapes=[pltpu.VMEM((T * B, D), jnp.float32),
                      pltpu.VMEM((T * B, D), jnp.float32),
                      pltpu.VMEM((T * B, D), jnp.float32)],
      compiler_params=pltpu.CompilerParams(
          vmem_limit_bytes=32 * 1024 * 1024),
  )(x_flat, mask_flat, wih_g, whh_g, bx_g, bhn)

  out = jnp.transpose(out_flat.reshape(T, B, D), (1, 0, 2))   # (B, T, D)
  return out, h


def reference_forward(words, lengths, emb, w_ih, w_hh, b_ih, b_hh):
  """Pure-JAX reference with identical math (for correctness checking)."""
  B, T = words.shape
  D = emb.shape[1]
  x = emb[words]                                           # (B, T, D)
  x = jnp.transpose(x, (1, 0, 2))                          # (T, B, D)
  tmask = jnp.arange(T)[:, None] < lengths[None, :]        # (T, B)
  wih = w_ih.T
  whh = w_hh.T

  def step(h, inp):
    x_t, m = inp
    gx = x_t @ wih + b_ih
    gh = h @ whh + b_hh
    r = jax.nn.sigmoid(gx[:, :D] + gh[:, :D])
    z = jax.nn.sigmoid(gx[:, D:2 * D] + gh[:, D:2 * D])
    n = jnp.tanh(gx[:, 2 * D:] + r * gh[:, 2 * D:])
    h_new = (1.0 - z) * n + z * h
    m2 = m[:, None]
    return jnp.where(m2, h_new, h), jnp.where(m2, h_new, 0.0)

  h_final, outs = jax.lax.scan(step, jnp.zeros((B, D), jnp.float32), (x, tmask))
  return jnp.transpose(outs, (1, 0, 2)), h_final


if __name__ == "__main__":
  # Small, deterministic configuration.
  B, T, D, V = 2, 8, 32, 20          # batch, seq len, args.dim, dict_size
  key = jax.random.PRNGKey(0)
  k_emb, k_wih, k_whh, k_bih, k_bhh, k_words = jax.random.split(key, 6)

  # Parameters (shapes match nn.Embedding(V, D, padding_idx=0) + nn.GRU(D, D)).
  emb = jax.random.normal(k_emb, (V, D), dtype=jnp.float32)
  emb = emb.at[0].set(0.0)                                  # padding_idx=0
  bound = 1.0 / math.sqrt(D)
  w_ih = jax.random.uniform(k_wih, (3 * D, D), jnp.float32, -bound, bound)
  w_hh = jax.random.uniform(k_whh, (3 * D, D), jnp.float32, -bound, bound)
  b_ih = jax.random.uniform(k_bih, (3 * D,), jnp.float32, -bound, bound)
  b_hh = jax.random.uniform(k_bhh, (3 * D,), jnp.float32, -bound, bound)

  # Inputs: padded token ids and per-sequence lengths (max(lengths) == T).
  lengths = jnp.array([8, 5], dtype=jnp.int32)
  tok = jax.random.randint(k_words, (B, T), 1, V, dtype=jnp.int32)
  pad_mask = jnp.arange(T)[None, :] < lengths[:, None]
  words = jnp.where(pad_mask, tok, 0).astype(jnp.int32)

  out, h = encoder_forward(words, lengths, emb, w_ih, w_hh, b_ih, b_hh)
  out = jax.block_until_ready(out)
  h = jax.block_until_ready(h)

  out_ref, h_ref = reference_forward(words, lengths, emb, w_ih, w_hh,
                                     b_ih, b_hh)
  np.testing.assert_allclose(np.asarray(out), np.asarray(out_ref),
                             rtol=1e-5, atol=1e-5)
  np.testing.assert_allclose(np.asarray(h), np.asarray(h_ref),
                             rtol=1e-5, atol=1e-5)

  print("KERNEL_OK")
</pallas_src>

<mosaic_0001>
module attributes {stable_mosaic.version = 11 : i64} {
  func.func @gru_encoder_kernel(%arg0: memref<16x32xf32, #tpu.memory_space<vmem>>, %arg1: memref<16x1xf32, #tpu.memory_space<vmem>>, %arg2: memref<3x32x32xf32, #tpu.memory_space<vmem>>, %arg3: memref<3x32x32xf32, #tpu.memory_space<vmem>>, %arg4: memref<3x1x32xf32, #tpu.memory_space<vmem>>, %arg5: memref<1x32xf32, #tpu.memory_space<vmem>>, %arg6: memref<16x32xf32, #tpu.memory_space<vmem>>, %arg7: memref<2x32xf32, #tpu.memory_space<vmem>>, %arg8: memref<16x32xf32, #tpu.memory_space<vmem>>, %arg9: memref<16x32xf32, #tpu.memory_space<vmem>>, %arg10: memref<16x32xf32, #tpu.memory_space<vmem>>) attributes {dimension_semantics = [], scalar_prefetch = 0 : i64, scratch_operands = 3 : i64, tpu.core_type = #tpu.core_type<tc>} {
    %c0 = arith.constant 0 : index
    %c0_0 = arith.constant 0 : index
    %0 = vector.load %arg0[%c0, %c0_0] : memref<16x32xf32, #tpu.memory_space<vmem>>, vector<16x32xf32>
    %c0_1 = arith.constant 0 : index
    %c0_2 = arith.constant 0 : index
    %c0_3 = arith.constant 0 : index
    %1 = vector.load %arg2[%c0_1, %c0_2, %c0_3] : memref<3x32x32xf32, #tpu.memory_space<vmem>>, vector<1x32x32xf32>
    %2 = vector.shape_cast %1 : vector<1x32x32xf32> to vector<32x32xf32>
    %cst = arith.constant dense<0.000000e+00> : vector<16x32xf32>
    %3 = tpu.matmul %0, %2, %cst {dimension_numbers = #tpu.dot_dimension_numbers<[1], [0], [0], [1], [0, 0, 1, 1], [], []>} : vector<16x32xf32>, vector<32x32xf32>, vector<16x32xf32> -> vector<16x32xf32>
    %c0_4 = arith.constant 0 : index
    %c0_5 = arith.constant 0 : index
    %c0_6 = arith.constant 0 : index
    %4 = vector.load %arg4[%c0_4, %c0_5, %c0_6] : memref<3x1x32xf32, #tpu.memory_space<vmem>>, vector<1x1x32xf32>
    %5 = vector.shape_cast %4 : vector<1x1x32xf32> to vector<1x32xf32>
    %6 = vector.broadcast %5 : vector<1x32xf32> to vector<16x32xf32>
    %7 = arith.addf %3, %6 : vector<16x32xf32>
    %c0_7 = arith.constant 0 : index
    %c0_8 = arith.constant 0 : index
    %8 = vector.load %arg8[%c0_7, %c0_8] : memref<16x32xf32, #tpu.memory_space<vmem>>, vector<16x32xf32>
    tpu.vector_store %arg8[%c0_7, %c0_8], %7 {strides = array<i32>} : memref<16x32xf32, #tpu.memory_space<vmem>>, vector<16x32xf32>,
    %c1 = arith.constant 1 : index
    %c0_9 = arith.constant 0 : index
    %c0_10 = arith.constant 0 : index
    %9 = vector.load %arg2[%c1, %c0_9, %c0_10] : memref<3x32x32xf32, #tpu.memory_space<vmem>>, vector<1x32x32xf32>
    %10 = vector.shape_cast %9 : vector<1x32x32xf32> to vector<32x32xf32>
    %cst_11 = arith.constant dense<0.000000e+00> : vector<16x32xf32>
    %11 = tpu.matmul %0, %10, %cst_11 {dimension_numbers = #tpu.dot_dimension_numbers<[1], [0], [0], [1], [0, 0, 1, 1], [], []>} : vector<16x32xf32>, vector<32x32xf32>, vector<16x32xf32> -> vector<16x32xf32>
    %c1_12 = arith.constant 1 : index
    %c0_13 = arith.constant 0 : index
    %c0_14 = arith.constant 0 : index
    %12 = vector.load %arg4[%c1_12, %c0_13, %c0_14] : memref<3x1x32xf32, #tpu.memory_space<vmem>>, vector<1x1x32xf32>
    %13 = vector.shape_cast %12 : vector<1x1x32xf32> to vector<1x32xf32>
    %14 = vector.broadcast %13 : vector<1x32xf32> to vector<16x32xf32>
    %15 = arith.addf %11, %14 : vector<16x32xf32>
    %c0_15 = arith.constant 0 : index
    %c0_16 = arith.constant 0 : index
    %16 = vector.load %arg9[%c0_15, %c0_16] : memref<16x32xf32, #tpu.memory_space<vmem>>, vector<16x32xf32>
    tpu.vector_store %arg9[%c0_15, %c0_16], %15 {strides = array<i32>} : memref<16x32xf32, #tpu.memory_space<vmem>>, vector<16x32xf32>,
    %c2 = arith.constant 2 : index
    %c0_17 = arith.constant 0 : index
    %c0_18 = arith.constant 0 : index
    %17 = vector.load %arg2[%c2, %c0_17, %c0_18] : memref<3x32x32xf32, #tpu.memory_space<vmem>>, vector<1x32x32xf32>
    %18 = vector.shape_cast %17 : vector<1x32x32xf32> to vector<32x32xf32>
    %cst_19 = arith.constant dense<0.000000e+00> : vector<16x32xf32>
    %19 = tpu.matmul %0, %18, %cst_19 {dimension_numbers = #tpu.dot_dimension_numbers<[1], [0], [0], [1], [0, 0, 1, 1], [], []>} : vector<16x32xf32>, vector<32x32xf32>, vector<16x32xf32> -> vector<16x32xf32>
    %c2_20 = arith.constant 2 : index
    %c0_21 = arith.constant 0 : index
    %c0_22 = arith.constant 0 : index
    %20 = vector.load %arg4[%c2_20, %c0_21, %c0_22] : memref<3x1x32xf32, #tpu.memory_space<vmem>>, vector<1x1x32xf32>
    %21 = vector.shape_cast %20 : vector<1x1x32xf32> to vector<1x32xf32>
    %22 = vector.broadcast %21 : vector<1x32xf32> to vector<16x32xf32>
    %23 = arith.addf %19, %22 : vector<16x32xf32>
    %c0_23 = arith.constant 0 : index
    %c0_24 = arith.constant 0 : index
    %24 = vector.load %arg10[%c0_23, %c0_24] : memref<16x32xf32, #tpu.memory_space<vmem>>, vector<16x32xf32>
    tpu.vector_store %arg10[%c0_23, %c0_24], %23 {strides = array<i32>} : memref<16x32xf32, #tpu.memory_space<vmem>>, vector<16x32xf32>,
    %c0_25 = arith.constant 0 : index
    %c0_26 = arith.constant 0 : index
    %c0_27 = arith.constant 0 : index
    %25 = vector.load %arg3[%c0_25, %c0_26, %c0_27] : memref<3x32x32xf32, #tpu.memory_space<vmem>>, vector<1x32x32xf32>
    %26 = vector.shape_cast %25 : vector<1x32x32xf32> to vector<32x32xf32>
    %c1_28 = arith.constant 1 : index
    %c0_29 = arith.constant 0 : index
    %c0_30 = arith.constant 0 : index
    %27 = vector.load %arg3[%c1_28, %c0_29, %c0_30] : memref<3x32x32xf32, #tpu.memory_space<vmem>>, vector<1x32x32xf32>
    %28 = vector.shape_cast %27 : vector<1x32x32xf32> to vector<32x32xf32>
    %c2_31 = arith.constant 2 : index
    %c0_32 = arith.constant 0 : index
    %c0_33 = arith.constant 0 : index
    %29 = vector.load %arg3[%c2_31, %c0_32, %c0_33] : memref<3x32x32xf32, #tpu.memory_space<vmem>>, vector<1x32x32xf32>
    %30 = vector.shape_cast %29 : vector<1x32x32xf32> to vector<32x32xf32>
    %c0_34 = arith.constant 0 : index
    %c0_35 = arith.constant 0 : index
    %31 = vector.load %arg5[%c0_34, %c0_35] : memref<1x32xf32, #tpu.memory_space<vmem>>, vector<1x32xf32>
    %cst_36 = arith.constant 0.000000e+00 : f32
    %32 = vector.broadcast %cst_36 : f32 to vector<2x32xf32>
    %c0_i32 = arith.constant 0 : i32
    %c2_i32 = arith.constant 2 : i32
    %33 = arith.muli %c0_i32, %c2_i32 : i32
    %34 = tpu.assume_multiple %33, 2 : i32
    %35 = arith.index_cast %34 : i32 to index
    %c0_37 = arith.constant 0 : index
    %36 = vector.load %arg8[%35, %c0_37] : memref<16x32xf32, #tpu.memory_space<vmem>>, vector<2x32xf32>
    %37 = arith.index_cast %34 : i32 to index
    %c0_38 = arith.constant 0 : index
    %38 = vector.load %arg9[%37, %c0_38] : memref<16x32xf32, #tpu.memory_space<vmem>>, vector<2x32xf32>
    %39 = arith.index_cast %34 : i32 to index
    %c0_39 = arith.constant 0 : index
    %40 = vector.load %arg10[%39, %c0_39] : memref<16x32xf32, #tpu.memory_space<vmem>>, vector<2x32xf32>
    %41 = arith.index_cast %34 : i32 to index
    %c0_40 = arith.constant 0 : index
    %42 = vector.load %arg1[%41, %c0_40] : memref<16x1xf32, #tpu.memory_space<vmem>>, vector<2x1xf32>
    %cst_41 = arith.constant dense<0.000000e+00> : vector<2x32xf32>
    %43 = tpu.matmul %32, %26, %cst_41 {dimension_numbers = #tpu.dot_dimension_numbers<[1], [0], [0], [1], [0, 0, 1, 1], [], []>} : vector<2x32xf32>, vector<32x32xf32>, vector<2x32xf32> -> vector<2x32xf32>
    %cst_42 = arith.constant dense<0.000000e+00> : vector<2x32xf32>
    %44 = tpu.matmul %32, %28, %cst_42 {dimension_numbers = #tpu.dot_dimension_numbers<[1], [0], [0], [1], [0, 0, 1, 1], [], []>} : vector<2x32xf32>, vector<32x32xf32>, vector<2x32xf32> -> vector<2x32xf32>
    %cst_43 = arith.constant dense<0.000000e+00> : vector<2x32xf32>
    %45 = tpu.matmul %32, %30, %cst_43 {dimension_numbers = #tpu.dot_dimension_numbers<[1], [0], [0], [1], [0, 0, 1, 1], [], []>} : vector<2x32xf32>, vector<32x32xf32>, vector<2x32xf32> -> vector<2x32xf32>
    %46 = vector.broadcast %31 : vector<1x32xf32> to vector<2x32xf32>
    %47 = arith.addf %45, %46 : vector<2x32xf32>
    %48 = arith.addf %36, %43 : vector<2x32xf32>
    %49 = arith.negf %48 : vector<2x32xf32>
    %50 = math.exp %49 : vector<2x32xf32>
    %cst_44 = arith.constant 1.000000e+00 : f32
    %51 = vector.broadcast %cst_44 : f32 to vector<2x32xf32>
    %52 = arith.addf %51, %50 : vector<2x32xf32>
    %53 = arith.divf %51, %52 : vector<2x32xf32>
    %54 = arith.addf %38, %44 : vector<2x32xf32>
    %55 = arith.negf %54 : vector<2x32xf32>
    %56 = math.exp %55 : vector<2x32xf32>
    %cst_45 = arith.constant 1.000000e+00 : f32
    %57 = vector.broadcast %cst_45 : f32 to vector<2x32xf32>
    %58 = arith.addf %57, %56 : vector<2x32xf32>
    %59 = arith.divf %57, %58 : vector<2x32xf32>
    %60 = arith.mulf %53, %47 : vector<2x32xf32>
    %61 = arith.addf %40, %60 : vector<2x32xf32>
    %62 = math.tanh %61 : vector<2x32xf32>
    %cst_46 = arith.constant 1.000000e+00 : f32
    %63 = vector.broadcast %cst_46 : f32 to vector<2x32xf32>
    %64 = arith.subf %63, %59 : vector<2x32xf32>
    %65 = arith.mulf %64, %62 : vector<2x32xf32>
    %66 = arith.mulf %59, %32 : vector<2x32xf32>
    %67 = arith.addf %65, %66 : vector<2x32xf32>
    %68 = arith.index_cast %34 : i32 to index
    %c0_47 = arith.constant 0 : index
    %69 = vector.load %arg6[%68, %c0_47] : memref<16x32xf32, #tpu.memory_space<vmem>>, vector<2x32xf32>
    tpu.vector_store %arg6[%68, %c0_47], %67 {strides = array<i32>} : memref<16x32xf32, #tpu.memory_space<vmem>>, vector<2x32xf32>,
    %cst_48 = arith.constant 5.000000e-01 : f32
    %70 = vector.broadcast %cst_48 : f32 to vector<2x1xf32>
    %71 = arith.cmpf ogt, %42, %70 : vector<2x1xf32>
    %72 = vector.shape_cast %71 : vector<2x1xi1> to vector<2x1xi1>
    %73 = vector.broadcast %72 : vector<2x1xi1> to vector<2x32xi1>
    %74 = arith.select %73, %67, %32 : vector<2x32xi1>, vector<2x32xf32>
    %c1_i32 = arith.constant 1 : i32
    %c2_i32_49 = arith.constant 2 : i32
    %75 = arith.muli %c1_i32, %c2_i32_49 : i32
    %76 = tpu.assume_multiple %75, 2 : i32
    %77 = arith.index_cast %76 : i32 to index
    %c0_50 = arith.constant 0 : index
    %78 = vector.load %arg8[%77, %c0_50] : memref<16x32xf32, #tpu.memory_space<vmem>>, vector<2x32xf32>
    %79 = arith.index_cast %76 : i32 to index
    %c0_51 = arith.constant 0 : index
    %80 = vector.load %arg9[%79, %c0_51] : memref<16x32xf32, #tpu.memory_space<vmem>>, vector<2x32xf32>
    %81 = arith.index_cast %76 : i32 to index
    %c0_52 = arith.constant 0 : index
    %82 = vector.load %arg10[%81, %c0_52] : memref<16x32xf32, #tpu.memory_space<vmem>>, vector<2x32xf32>
    %83 = arith.index_cast %76 : i32 to index
    %c0_53 = arith.constant 0 : index
    %84 = vector.load %arg1[%83, %c0_53] : memref<16x1xf32, #tpu.memory_space<vmem>>, vector<2x1xf32>
    %cst_54 = arith.constant dense<0.000000e+00> : vector<2x32xf32>
    %85 = tpu.matmul %74, %26, %cst_54 {dimension_numbers = #tpu.dot_dimension_numbers<[1], [0], [0], [1], [0, 0, 1, 1], [], []>} : vector<2x32xf32>, vector<32x32xf32>, vector<2x32xf32> -> vector<2x32xf32>
    %cst_55 = arith.constant dense<0.000000e+00> : vector<2x32xf32>
    %86 = tpu.matmul %74, %28, %cst_55 {dimension_numbers = #tpu.dot_dimension_numbers<[1], [0], [0], [1], [0, 0, 1, 1], [], []>} : vector<2x32xf32>, vector<32x32xf32>, vector<2x32xf32> -> vector<2x32xf32>
    %cst_56 = arith.constant dense<0.000000e+00> : vector<2x32xf32>
    %87 = tpu.matmul %74, %30, %cst_56 {dimension_numbers = #tpu.dot_dimension_numbers<[1], [0], [0], [1], [0, 0, 1, 1], [], []>} : vector<2x32xf32>, vector<32x32xf32>, vector<2x32xf32> -> vector<2x32xf32>
    %88 = vector.broadcast %31 : vector<1x32xf32> to vector<2x32xf32>
    %89 = arith.addf %87, %88 : vector<2x32xf32>
    %90 = arith.addf %78, %85 : vector<2x32xf32>
    %91 = arith.negf %90 : vector<2x32xf32>
    %92 = math.exp %91 : vector<2x32xf32>
    %cst_57 = arith.constant 1.000000e+00 : f32
    %93 = vector.broadcast %cst_57 : f32 to vector<2x32xf32>
    %94 = arith.addf %93, %92 : vector<2x32xf32>
    %95 = arith.divf %93, %94 : vector<2x32xf32>
    %96 = arith.addf %80, %86 : vector<2x32xf32>
    %97 = arith.negf %96 : vector<2x32xf32>
    %98 = math.exp %97 : vector<2x32xf32>
    %cst_58 = arith.constant 1.000000e+00 : f32
    %99 = vector.broadcast %cst_58 : f32 to vector<2x32xf32>
    %100 = arith.addf %99, %98 : vector<2x32xf32>
    %101 = arith.divf %99, %100 : vector<2x32xf32>
    %102 = arith.mulf %95, %89 : vector<2x32xf32>
    %103 = arith.addf %82, %102 : vector<2x32xf32>
    %104 = math.tanh %103 : vector<2x32xf32>
    %cst_59 = arith.constant 1.000000e+00 : f32
    %105 = vector.broadcast %cst_59 : f32 to vector<2x32xf32>
    %106 = arith.subf %105, %101 : vector<2x32xf32>
    %107 = arith.mulf %106, %104 : vector<2x32xf32>
    %108 = arith.mulf %101, %74 : vector<2x32xf32>
    %109 = arith.addf %107, %108 : vector<2x32xf32>
    %110 = arith.index_cast %76 : i32 to index
    %c0_60 = arith.constant 0 : index
    %111 = vector.load %arg6[%110, %c0_60] : memref<16x32xf32, #tpu.memory_space<vmem>>, vector<2x32xf32>
    tpu.vector_store %arg6[%110, %c0_60], %109 {strides = array<i32>} : memref<16x32xf32, #tpu.memory_space<vmem>>, vector<2x32xf32>,
    %cst_61 = arith.constant 5.000000e-01 : f32
    %112 = vector.broadcast %cst_61 : f32 to vector<2x1xf32>
    %113 = arith.cmpf ogt, %84, %112 : vector<2x1xf32>
    %114 = vector.shape_cast %113 : vector<2x1xi1> to vector<2x1xi1>
    %115 = vector.broadcast %114 : vector<2x1xi1> to vector<2x32xi1>
    %116 = arith.select %115, %109, %74 : vector<2x32xi1>, vector<2x32xf32>
    %c2_i32_62 = arith.constant 2 : i32
    %c2_i32_63 = arith.constant 2 : i32
    %117 = arith.muli %c2_i32_62, %c2_i32_63 : i32
    %118 = tpu.assume_multiple %117, 2 : i32
    %119 = arith.index_cast %118 : i32 to index
    %c0_64 = arith.constant 0 : index
    %120 = vector.load %arg8[%119, %c0_64] : memref<16x32xf32, #tpu.memory_space<vmem>>, vector<2x32xf32>
    %121 = arith.index_cast %118 : i32 to index
    %c0_65 = arith.constant 0 : index
    %122 = vector.load %arg9[%121, %c0_65] : memref<16x32xf32, #tpu.memory_space<vmem>>, vector<2x32xf32>
    %123 = arith.index_cast %118 : i32 to index
    %c0_66 = arith.constant 0 : index
    %124 = vector.load %arg10[%123, %c0_66] : memref<16x32xf32, #tpu.memory_space<vmem>>, vector<2x32xf32>
    %125 = arith.index_cast %118 : i32 to index
    %c0_67 = arith.constant 0 : index
    %126 = vector.load %arg1[%125, %c0_67] : memref<16x1xf32, #tpu.memory_space<vmem>>, vector<2x1xf32>
    %cst_68 = arith.constant dense<0.000000e+00> : vector<2x32xf32>
    %127 = tpu.matmul %116, %26, %cst_68 {dimension_numbers = #tpu.dot_dimension_numbers<[1], [0], [0], [1], [0, 0, 1, 1], [], []>} : vector<2x32xf32>, vector<32x32xf32>, vector<2x32xf32> -> vector<2x32xf32>
    %cst_69 = arith.constant dense<0.000000e+00> : vector<2x32xf32>
    %128 = tpu.matmul %116, %28, %cst_69 {dimension_numbers = #tpu.dot_dimension_numbers<[1], [0], [0], [1], [0, 0, 1, 1], [], []>} : vector<2x32xf32>, vector<32x32xf32>, vector<2x32xf32> -> vector<2x32xf32>
    %cst_70 = arith.constant dense<0.000000e+00> : vector<2x32xf32>
    %129 = tpu.matmul %116, %30, %cst_70 {dimension_numbers = #tpu.dot_dimension_numbers<[1], [0], [0], [1], [0, 0, 1, 1], [], []>} : vector<2x32xf32>, vector<32x32xf32>, vector<2x32xf32> -> vector<2x32xf32>
    %130 = vector.broadcast %31 : vector<1x32xf32> to vector<2x32xf32>
    %131 = arith.addf %129, %130 : vector<2x32xf32>
    %132 = arith.addf %120, %127 : vector<2x32xf32>
    %133 = arith.negf %132 : vector<2x32xf32>
    %134 = math.exp %133 : vector<2x32xf32>
    %cst_71 = arith.constant 1.000000e+00 : f32
    %135 = vector.broadcast %cst_71 : f32 to vector<2x32xf32>
    %136 = arith.addf %135, %134 : vector<2x32xf32>
    %137 = arith.divf %135, %136 : vector<2x32xf32>
    %138 = arith.addf %122, %128 : vector<2x32xf32>
    %139 = arith.negf %138 : vector<2x32xf32>
    %140 = math.exp %139 : vector<2x32xf32>
    %cst_72 = arith.constant 1.000000e+00 : f32
    %141 = vector.broadcast %cst_72 : f32 to vector<2x32xf32>
    %142 = arith.addf %141, %140 : vector<2x32xf32>
    %143 = arith.divf %141, %142 : vector<2x32xf32>
    %144 = arith.mulf %137, %131 : vector<2x32xf32>
    %145 = arith.addf %124, %144 : vector<2x32xf32>
    %146 = math.tanh %145 : vector<2x32xf32>
    %cst_73 = arith.constant 1.000000e+00 : f32
    %147 = vector.broadcast %cst_73 : f32 to vector<2x32xf32>
    %148 = arith.subf %147, %143 : vector<2x32xf32>
    %149 = arith.mulf %148, %146 : vector<2x32xf32>
    %150 = arith.mulf %143, %116 : vector<2x32xf32>
    %151 = arith.addf %149, %150 : vector<2x32xf32>
    %152 = arith.index_cast %118 : i32 to index
    %c0_74 = arith.constant 0 : index
    %153 = vector.load %arg6[%152, %c0_74] : memref<16x32xf32, #tpu.memory_space<vmem>>, vector<2x32xf32>
    tpu.vector_store %arg6[%152, %c0_74], %151 {strides = array<i32>} : memref<16x32xf32, #tpu.memory_space<vmem>>, vector<2x32xf32>,
    %cst_75 = arith.constant 5.000000e-01 : f32
    %154 = vector.broadcast %cst_75 : f32 to vector<2x1xf32>
    %155 = arith.cmpf ogt, %126, %154 : vector<2x1xf32>
    %156 = vector.shape_cast %155 : vector<2x1xi1> to vector<2x1xi1>
    %157 = vector.broadcast %156 : vector<2x1xi1> to vector<2x32xi1>
    %158 = arith.select %157, %151, %116 : vector<2x32xi1>, vector<2x32xf32>
    %c3_i32 = arith.constant 3 : i32
    %c2_i32_76 = arith.constant 2 : i32
    %159 = arith.muli %c3_i32, %c2_i32_76 : i32
    %160 = tpu.assume_multiple %159, 2 : i32
    %161 = arith.index_cast %160 : i32 to index
    %c0_77 = arith.constant 0 : index
    %162 = vector.load %arg8[%161, %c0_77] : memref<16x32xf32, #tpu.memory_space<vmem>>, vector<2x32xf32>
    %163 = arith.index_cast %160 : i32 to index
    %c0_78 = arith.constant 0 : index
    %164 = vector.load %arg9[%163, %c0_78] : memref<16x32xf32, #tpu.memory_space<vmem>>, vector<2x32xf32>
    %165 = arith.index_cast %160 : i32 to index
    %c0_79 = arith.constant 0 : index
    %166 = vector.load %arg10[%165, %c0_79] : memref<16x32xf32, #tpu.memory_space<vmem>>, vector<2x32xf32>
    %167 = arith.index_cast %160 : i32 to index
    %c0_80 = arith.constant 0 : index
    %168 = vector.load %arg1[%167, %c0_80] : memref<16x1xf32, #tpu.memory_space<vmem>>, vector<2x1xf32>
    %cst_81 = arith.constant dense<0.000000e+00> : vector<2x32xf32>
    %169 = tpu.matmul %158, %26, %cst_81 {dimension_numbers = #tpu.dot_dimension_numbers<[1], [0], [0], [1], [0, 0, 1, 1], [], []>} : vector<2x32xf32>, vector<32x32xf32>, vector<2x32xf32> -> vector<2x32xf32>
    %cst_82 = arith.constant dense<0.000000e+00> : vector<2x32xf32>
    %170 = tpu.matmul %158, %28, %cst_82 {dimension_numbers = #tpu.dot_dimension_numbers<[1], [0], [0], [1], [0, 0, 1, 1], [], []>} : vector<2x32xf32>, vector<32x32xf32>, vector<2x32xf32> -> vector<2x32xf32>
    %cst_83 = arith.constant dense<0.000000e+00> : vector<2x32xf32>
    %171 = tpu.matmul %158, %30, %cst_83 {dimension_numbers = #tpu.dot_dimension_numbers<[1], [0], [0], [1], [0, 0, 1, 1], [], []>} : vector<2x32xf32>, vector<32x32xf32>, vector<2x32xf32> -> vector<2x32xf32>
    %172 = vector.broadcast %31 : vector<1x32xf32> to vector<2x32xf32>
    %173 = arith.addf %171, %172 : vector<2x32xf32>
    %174 = arith.addf %162, %169 : vector<2x32xf32>
    %175 = arith.negf %174 : vector<2x32xf32>
    %176 = math.exp %175 : vector<2x32xf32>
    %cst_84 = arith.constant 1.000000e+00 : f32
    %177 = vector.broadcast %cst_84 : f32 to vector<2x32xf32>
    %178 = arith.addf %177, %176 : vector<2x32xf32>
    %179 = arith.divf %177, %178 : vector<2x32xf32>
    %180 = arith.addf %164, %170 : vector<2x32xf32>
    %181 = arith.negf %180 : vector<2x32xf32>
    %182 = math.exp %181 : vector<2x32xf32>
    %cst_85 = arith.constant 1.000000e+00 : f32
    %183 = vector.broadcast %cst_85 : f32 to vector<2x32xf32>
    %184 = arith.addf %183, %182 : vector<2x32xf32>
    %185 = arith.divf %183, %184 : vector<2x32xf32>
    %186 = arith.mulf %179, %173 : vector<2x32xf32>
    %187 = arith.addf %166, %186 : vector<2x32xf32>
    %188 = math.tanh %187 : vector<2x32xf32>
    %cst_86 = arith.constant 1.000000e+00 : f32
    %189 = vector.broadcast %cst_86 : f32 to vector<2x32xf32>
    %190 = arith.subf %189, %185 : vector<2x32xf32>
    %191 = arith.mulf %190, %188 : vector<2x32xf32>
    %192 = arith.mulf %185, %158 : vector<2x32xf32>
    %193 = arith.addf %191, %192 : vector<2x32xf32>
    %194 = arith.index_cast %160 : i32 to index
    %c0_87 = arith.constant 0 : index
    %195 = vector.load %arg6[%194, %c0_87] : memref<16x32xf32, #tpu.memory_space<vmem>>, vector<2x32xf32>
    tpu.vector_store %arg6[%194, %c0_87], %193 {strides = array<i32>} : memref<16x32xf32, #tpu.memory_space<vmem>>, vector<2x32xf32>,
    %cst_88 = arith.constant 5.000000e-01 : f32
    %196 = vector.broadcast %cst_88 : f32 to vector<2x1xf32>
    %197 = arith.cmpf ogt, %168, %196 : vector<2x1xf32>
    %198 = vector.shape_cast %197 : vector<2x1xi1> to vector<2x1xi1>
    %199 = vector.broadcast %198 : vector<2x1xi1> to vector<2x32xi1>
    %200 = arith.select %199, %193, %158 : vector<2x32xi1>, vector<2x32xf32>
    %c4_i32 = arith.constant 4 : i32
    %c2_i32_89 = arith.constant 2 : i32
    %201 = arith.muli %c4_i32, %c2_i32_89 : i32
    %202 = tpu.assume_multiple %201, 2 : i32
    %203 = arith.index_cast %202 : i32 to index
    %c0_90 = arith.constant 0 : index
    %204 = vector.load %arg8[%203, %c0_90] : memref<16x32xf32, #tpu.memory_space<vmem>>, vector<2x32xf32>
    %205 = arith.index_cast %202 : i32 to index
    %c0_91 = arith.constant 0 : index
    %206 = vector.load %arg9[%205, %c0_91] : memref<16x32xf32, #tpu.memory_space<vmem>>, vector<2x32xf32>
    %207 = arith.index_cast %202 : i32 to index
    %c0_92 = arith.constant 0 : index
    %208 = vector.load %arg10[%207, %c0_92] : memref<16x32xf32, #tpu.memory_space<vmem>>, vector<2x32xf32>
    %209 = arith.index_cast %202 : i32 to index
    %c0_93 = arith.constant 0 : index
    %210 = vector.load %arg1[%209, %c0_93] : memref<16x1xf32, #tpu.memory_space<vmem>>, vector<2x1xf32>
    %cst_94 = arith.constant dense<0.000000e+00> : vector<2x32xf32>
    %211 = tpu.matmul %200, %26, %cst_94 {dimension_numbers = #tpu.dot_dimension_numbers<[1], [0], [0], [1], [0, 0, 1, 1], [], []>} : vector<2x32xf32>, vector<32x32xf32>, vector<2x32xf32> -> vector<2x32xf32>
    %cst_95 = arith.constant dense<0.000000e+00> : vector<2x32xf32>
    %212 = tpu.matmul %200, %28, %cst_95 {dimension_numbers = #tpu.dot_dimension_numbers<[1], [0], [0], [1], [0, 0, 1, 1], [], []>} : vector<2x32xf32>, vector<32x32xf32>, vector<2x32xf32> -> vector<2x32xf32>
    %cst_96 = arith.constant dense<0.000000e+00> : vector<2x32xf32>
    %213 = tpu.matmul %200, %30, %cst_96 {dimension_numbers = #tpu.dot_dimension_numbers<[1], [0], [0], [1], [0, 0, 1, 1], [], []>} : vector<2x32xf32>, vector<32x32xf32>, vector<2x32xf32> -> vector<2x32xf32>
    %214 = vector.broadcast %31 : vector<1x32xf32> to vector<2x32xf32>
    %215 = arith.addf %213, %214 : vector<2x32xf32>
    %216 = arith.addf %204, %211 : vector<2x32xf32>
    %217 = arith.negf %216 : vector<2x32xf32>
    %218 = math.exp %217 : vector<2x32xf32>
    %cst_97 = arith.constant 1.000000e+00 : f32
    %219 = vector.broadcast %cst_97 : f32 to vector<2x32xf32>
    %220 = arith.addf %219, %218 : vector<2x32xf32>
    %221 = arith.divf %219, %220 : vector<2x32xf32>
    %222 = arith.addf %206, %212 : vector<2x32xf32>
    %223 = arith.negf %222 : vector<2x32xf32>
    %224 = math.exp %223 : vector<2x32xf32>
    %cst_98 = arith.constant 1.000000e+00 : f32
    %225 = vector.broadcast %cst_98 : f32 to vector<2x32xf32>
    %226 = arith.addf %225, %224 : vector<2x32xf32>
    %227 = arith.divf %225, %226 : vector<2x32xf32>
    %228 = arith.mulf %221, %215 : vector<2x32xf32>
    %229 = arith.addf %208, %228 : vector<2x32xf32>
    %230 = math.tanh %229 : vector<2x32xf32>
    %cst_99 = arith.constant 1.000000e+00 : f32
    %231 = vector.broadcast %cst_99 : f32 to vector<2x32xf32>
    %232 = arith.subf %231, %227 : vector<2x32xf32>
    %233 = arith.mulf %232, %230 : vector<2x32xf32>
    %234 = arith.mulf %227, %200 : vector<2x32xf32>
    %235 = arith.addf %233, %234 : vector<2x32xf32>
    %236 = arith.index_cast %202 : i32 to index
    %c0_100 = arith.constant 0 : index
    %237 = vector.load %arg6[%236, %c0_100] : memref<16x32xf32, #tpu.memory_space<vmem>>, vector<2x32xf32>
    tpu.vector_store %arg6[%236, %c0_100], %235 {strides = array<i32>} : memref<16x32xf32, #tpu.memory_space<vmem>>, vector<2x32xf32>,
    %cst_101 = arith.constant 5.000000e-01 : f32
    %238 = vector.broadcast %cst_101 : f32 to vector<2x1xf32>
    %239 = arith.cmpf ogt, %210, %238 : vector<2x1xf32>
    %240 = vector.shape_cast %239 : vector<2x1xi1> to vector<2x1xi1>
    %241 = vector.broadcast %240 : vector<2x1xi1> to vector<2x32xi1>
    %242 = arith.select %241, %235, %200 : vector<2x32xi1>, vector<2x32xf32>
    %c5_i32 = arith.constant 5 : i32
    %c2_i32_102 = arith.constant 2 : i32
    %243 = arith.muli %c5_i32, %c2_i32_102 : i32
    %244 = tpu.assume_multiple %243, 2 : i32
    %245 = arith.index_cast %244 : i32 to index
    %c0_103 = arith.constant 0 : index
    %246 = vector.load %arg8[%245, %c0_103] : memref<16x32xf32, #tpu.memory_space<vmem>>, vector<2x32xf32>
    %247 = arith.index_cast %244 : i32 to index
    %c0_104 = arith.constant 0 : index
    %248 = vector.load %arg9[%247, %c0_104] : memref<16x32xf32, #tpu.memory_space<vmem>>, vector<2x32xf32>
    %249 = arith.index_cast %244 : i32 to index
    %c0_105 = arith.constant 0 : index
    %250 = vector.load %arg10[%249, %c0_105] : memref<16x32xf32, #tpu.memory_space<vmem>>, vector<2x32xf32>
    %251 = arith.index_cast %244 : i32 to index
    %c0_106 = arith.constant 0 : index
    %252 = vector.load %arg1[%251, %c0_106] : memref<16x1xf32, #tpu.memory_space<vmem>>, vector<2x1xf32>
    %cst_107 = arith.constant dense<0.000000e+00> : vector<2x32xf32>
    %253 = tpu.matmul %242, %26, %cst_107 {dimension_numbers = #tpu.dot_dimension_numbers<[1], [0], [0], [1], [0, 0, 1, 1], [], []>} : vector<2x32xf32>, vector<32x32xf32>, vector<2x32xf32> -> vector<2x32xf32>
    %cst_108 = arith.constant dense<0.000000e+00> : vector<2x32xf32>
    %254 = tpu.matmul %242, %28, %cst_108 {dimension_numbers = #tpu.dot_dimension_numbers<[1], [0], [0], [1], [0, 0, 1, 1], [], []>} : vector<2x32xf32>, vector<32x32xf32>, vector<2x32xf32> -> vector<2x32xf32>
    %cst_109 = arith.constant dense<0.000000e+00> : vector<2x32xf32>
    %255 = tpu.matmul %242, %30, %cst_109 {dimension_numbers = #tpu.dot_dimension_numbers<[1], [0], [0], [1], [0, 0, 1, 1], [], []>} : vector<2x32xf32>, vector<32x32xf32>, vector<2x32xf32> -> vector<2x32xf32>
    %256 = vector.broadcast %31 : vector<1x32xf32> to vector<2x32xf32>
    %257 = arith.addf %255, %256 : vector<2x32xf32>
    %258 = arith.addf %246, %253 : vector<2x32xf32>
    %259 = arith.negf %258 : vector<2x32xf32>
    %260 = math.exp %259 : vector<2x32xf32>
    %cst_110 = arith.constant 1.000000e+00 : f32
    %261 = vector.broadcast %cst_110 : f32 to vector<2x32xf32>
    %262 = arith.addf %261, %260 : vector<2x32xf32>
    %263 = arith.divf %261, %262 : vector<2x32xf32>
    %264 = arith.addf %248, %254 : vector<2x32xf32>
    %265 = arith.negf %264 : vector<2x32xf32>
    %266 = math.exp %265 : vector<2x32xf32>
    %cst_111 = arith.constant 1.000000e+00 : f32
    %267 = vector.broadcast %cst_111 : f32 to vector<2x32xf32>
    %268 = arith.addf %267, %266 : vector<2x32xf32>
    %269 = arith.divf %267, %268 : vector<2x32xf32>
    %270 = arith.mulf %263, %257 : vector<2x32xf32>
    %271 = arith.addf %250, %270 : vector<2x32xf32>
    %272 = math.tanh %271 : vector<2x32xf32>
    %cst_112 = arith.constant 1.000000e+00 : f32
    %273 = vector.broadcast %cst_112 : f32 to vector<2x32xf32>
    %274 = arith.subf %273, %269 : vector<2x32xf32>
    %275 = arith.mulf %274, %272 : vector<2x32xf32>
    %276 = arith.mulf %269, %242 : vector<2x32xf32>
    %277 = arith.addf %275, %276 : vector<2x32xf32>
    %278 = arith.index_cast %244 : i32 to index
    %c0_113 = arith.constant 0 : index
    %279 = vector.load %arg6[%278, %c0_113] : memref<16x32xf32, #tpu.memory_space<vmem>>, vector<2x32xf32>
    tpu.vector_store %arg6[%278, %c0_113], %277 {strides = array<i32>} : memref<16x32xf32, #tpu.memory_space<vmem>>, vector<2x32xf32>,
    %cst_114 = arith.constant 5.000000e-01 : f32
    %280 = vector.broadcast %cst_114 : f32 to vector<2x1xf32>
    %281 = arith.cmpf ogt, %252, %280 : vector<2x1xf32>
    %282 = vector.shape_cast %281 : vector<2x1xi1> to vector<2x1xi1>
    %283 = vector.broadcast %282 : vector<2x1xi1> to vector<2x32xi1>
    %284 = arith.select %283, %277, %242 : vector<2x32xi1>, vector<2x32xf32>
    %c6_i32 = arith.constant 6 : i32
    %c2_i32_115 = arith.constant 2 : i32
    %285 = arith.muli %c6_i32, %c2_i32_115 : i32
    %286 = tpu.assume_multiple %285, 2 : i32
    %287 = arith.index_cast %286 : i32 to index
    %c0_116 = arith.constant 0 : index
    %288 = vector.load %arg8[%287, %c0_116] : memref<16x32xf32, #tpu.memory_space<vmem>>, vector<2x32xf32>
    %289 = arith.index_cast %286 : i32 to index
    %c0_117 = arith.constant 0 : index
    %290 = vector.load %arg9[%289, %c0_117] : memref<16x32xf32, #tpu.memory_space<vmem>>, vector<2x32xf32>
    %291 = arith.index_cast %286 : i32 to index
    %c0_118 = arith.constant 0 : index
    %292 = vector.load %arg10[%291, %c0_118] : memref<16x32xf32, #tpu.memory_space<vmem>>, vector<2x32xf32>
    %293 = arith.index_cast %286 : i32 to index
    %c0_119 = arith.constant 0 : index
    %294 = vector.load %arg1[%293, %c0_119] : memref<16x1xf32, #tpu.memory_space<vmem>>, vector<2x1xf32>
    %cst_120 = arith.constant dense<0.000000e+00> : vector<2x32xf32>
    %295 = tpu.matmul %284, %26, %cst_120 {dimension_numbers = #tpu.dot_dimension_numbers<[1], [0], [0], [1], [0, 0, 1, 1], [], []>} : vector<2x32xf32>, vector<32x32xf32>, vector<2x32xf32> -> vector<2x32xf32>
    %cst_121 = arith.constant dense<0.000000e+00> : vector<2x32xf32>
    %296 = tpu.matmul %284, %28, %cst_121 {dimension_numbers = #tpu.dot_dimension_numbers<[1], [0], [0], [1], [0, 0, 1, 1], [], []>} : vector<2x32xf32>, vector<32x32xf32>, vector<2x32xf32> -> vector<2x32xf32>
    %cst_122 = arith.constant dense<0.000000e+00> : vector<2x32xf32>
    %297 = tpu.matmul %284, %30, %cst_122 {dimension_numbers = #tpu.dot_dimension_numbers<[1], [0], [0], [1], [0, 0, 1, 1], [], []>} : vector<2x32xf32>, vector<32x32xf32>, vector<2x32xf32> -> vector<2x32xf32>
    %298 = vector.broadcast %31 : vector<1x32xf32> to vector<2x32xf32>
    %299 = arith.addf %297, %298 : vector<2x32xf32>
    %300 = arith.addf %288, %295 : vector<2x32xf32>
    %301 = arith.negf %300 : vector<2x32xf32>
    %302 = math.exp %301 : vector<2x32xf32>
    %cst_123 = arith.constant 1.000000e+00 : f32
    %303 = vector.broadcast %cst_123 : f32 to vector<2x32xf32>
    %304 = arith.addf %303, %302 : vector<2x32xf32>
    %305 = arith.divf %303, %304 : vector<2x32xf32>
    %306 = arith.addf %290, %296 : vector<2x32xf32>
    %307 = arith.negf %306 : vector<2x32xf32>
    %308 = math.exp %307 : vector<2x32xf32>
    %cst_124 = arith.constant 1.000000e+00 : f32
    %309 = vector.broadcast %cst_124 : f32 to vector<2x32xf32>
    %310 = arith.addf %309, %308 : vector<2x32xf32>
    %311 = arith.divf %309, %310 : vector<2x32xf32>
    %312 = arith.mulf %305, %299 : vector<2x32xf32>
    %313 = arith.addf %292, %312 : vector<2x32xf32>
    %314 = math.tanh %313 : vector<2x32xf32>
    %cst_125 = arith.constant 1.000000e+00 : f32
    %315 = vector.broadcast %cst_125 : f32 to vector<2x32xf32>
    %316 = arith.subf %315, %311 : vector<2x32xf32>
    %317 = arith.mulf %316, %314 : vector<2x32xf32>
    %318 = arith.mulf %311, %284 : vector<2x32xf32>
    %319 = arith.addf %317, %318 : vector<2x32xf32>
    %320 = arith.index_cast %286 : i32 to index
    %c0_126 = arith.constant 0 : index
    %321 = vector.load %arg6[%320, %c0_126] : memref<16x32xf32, #tpu.memory_space<vmem>>, vector<2x32xf32>
    tpu.vector_store %arg6[%320, %c0_126], %319 {strides = array<i32>} : memref<16x32xf32, #tpu.memory_space<vmem>>, vector<2x32xf32>,
    %cst_127 = arith.constant 5.000000e-01 : f32
    %322 = vector.broadcast %cst_127 : f32 to vector<2x1xf32>
    %323 = arith.cmpf ogt, %294, %322 : vector<2x1xf32>
    %324 = vector.shape_cast %323 : vector<2x1xi1> to vector<2x1xi1>
    %325 = vector.broadcast %324 : vector<2x1xi1> to vector<2x32xi1>
    %326 = arith.select %325, %319, %284 : vector<2x32xi1>, vector<2x32xf32>
    %c7_i32 = arith.constant 7 : i32
    %c2_i32_128 = arith.constant 2 : i32
    %327 = arith.muli %c7_i32, %c2_i32_128 : i32
    %328 = tpu.assume_multiple %327, 2 : i32
    %329 = arith.index_cast %328 : i32 to index
    %c0_129 = arith.constant 0 : index
    %330 = vector.load %arg8[%329, %c0_129] : memref<16x32xf32, #tpu.memory_space<vmem>>, vector<2x32xf32>
    %331 = arith.index_cast %328 : i32 to index
    %c0_130 = arith.constant 0 : index
    %332 = vector.load %arg9[%331, %c0_130] : memref<16x32xf32, #tpu.memory_space<vmem>>, vector<2x32xf32>
    %333 = arith.index_cast %328 : i32 to index
    %c0_131 = arith.constant 0 : index
    %334 = vector.load %arg10[%333, %c0_131] : memref<16x32xf32, #tpu.memory_space<vmem>>, vector<2x32xf32>
    %335 = arith.index_cast %328 : i32 to index
    %c0_132 = arith.constant 0 : index
    %336 = vector.load %arg1[%335, %c0_132] : memref<16x1xf32, #tpu.memory_space<vmem>>, vector<2x1xf32>
    %cst_133 = arith.constant dense<0.000000e+00> : vector<2x32xf32>
    %337 = tpu.matmul %326, %26, %cst_133 {dimension_numbers = #tpu.dot_dimension_numbers<[1], [0], [0], [1], [0, 0, 1, 1], [], []>} : vector<2x32xf32>, vector<32x32xf32>, vector<2x32xf32> -> vector<2x32xf32>
    %cst_134 = arith.constant dense<0.000000e+00> : vector<2x32xf32>
    %338 = tpu.matmul %326, %28, %cst_134 {dimension_numbers = #tpu.dot_dimension_numbers<[1], [0], [0], [1], [0, 0, 1, 1], [], []>} : vector<2x32xf32>, vector<32x32xf32>, vector<2x32xf32> -> vector<2x32xf32>
    %cst_135 = arith.constant dense<0.000000e+00> : vector<2x32xf32>
    %339 = tpu.matmul %326, %30, %cst_135 {dimension_numbers = #tpu.dot_dimension_numbers<[1], [0], [0], [1], [0, 0, 1, 1], [], []>} : vector<2x32xf32>, vector<32x32xf32>, vector<2x32xf32> -> vector<2x32xf32>
    %340 = vector.broadcast %31 : vector<1x32xf32> to vector<2x32xf32>
    %341 = arith.addf %339, %340 : vector<2x32xf32>
    %342 = arith.addf %330, %337 : vector<2x32xf32>
    %343 = arith.negf %342 : vector<2x32xf32>
    %344 = math.exp %343 : vector<2x32xf32>
    %cst_136 = arith.constant 1.000000e+00 : f32
    %345 = vector.broadcast %cst_136 : f32 to vector<2x32xf32>
    %346 = arith.addf %345, %344 : vector<2x32xf32>
    %347 = arith.divf %345, %346 : vector<2x32xf32>
    %348 = arith.addf %332, %338 : vector<2x32xf32>
    %349 = arith.negf %348 : vector<2x32xf32>
    %350 = math.exp %349 : vector<2x32xf32>
    %cst_137 = arith.constant 1.000000e+00 : f32
    %351 = vector.broadcast %cst_137 : f32 to vector<2x32xf32>
    %352 = arith.addf %351, %350 : vector<2x32xf32>
    %353 = arith.divf %351, %352 : vector<2x32xf32>
    %354 = arith.mulf %347, %341 : vector<2x32xf32>
    %355 = arith.addf %334, %354 : vector<2x32xf32>
    %356 = math.tanh %355 : vector<2x32xf32>
    %cst_138 = arith.constant 1.000000e+00 : f32
    %357 = vector.broadcast %cst_138 : f32 to vector<2x32xf32>
    %358 = arith.subf %357, %353 : vector<2x32xf32>
    %359 = arith.mulf %358, %356 : vector<2x32xf32>
    %360 = arith.mulf %353, %326 : vector<2x32xf32>
    %361 = arith.addf %359, %360 : vector<2x32xf32>
    %362 = arith.index_cast %328 : i32 to index
    %c0_139 = arith.constant 0 : index
    %363 = vector.load %arg6[%362, %c0_139] : memref<16x32xf32, #tpu.memory_space<vmem>>, vector<2x32xf32>
    tpu.vector_store %arg6[%362, %c0_139], %361 {strides = array<i32>} : memref<16x32xf32, #tpu.memory_space<vmem>>, vector<2x32xf32>,
    %cst_140 = arith.constant 5.000000e-01 : f32
    %364 = vector.broadcast %cst_140 : f32 to vector<2x1xf32>
    %365 = arith.cmpf ogt, %336, %364 : vector<2x1xf32>
    %366 = vector.shape_cast %365 : vector<2x1xi1> to vector<2x1xi1>
    %367 = vector.broadcast %366 : vector<2x1xi1> to vector<2x32xi1>
    %368 = arith.select %367, %361, %326 : vector<2x32xi1>, vector<2x32xf32>
    %c8_i32 = arith.constant 8 : i32
    %c0_141 = arith.constant 0 : index
    %c0_142 = arith.constant 0 : index
    %369 = vector.load %arg7[%c0_141, %c0_142] : memref<2x32xf32, #tpu.memory_space<vmem>>, vector<2x32xf32>
    tpu.vector_store %arg7[%c0_141, %c0_142], %368 {strides = array<i32>} : memref<2x32xf32, #tpu.memory_space<vmem>>, vector<2x32xf32>,
    %c0_143 = arith.constant 0 : index
    %c0_144 = arith.constant 0 : index
    %370 = vector.load %arg6[%c0_143, %c0_144] : memref<16x32xf32, #tpu.memory_space<vmem>>, vector<16x32xf32>
    %c0_145 = arith.constant 0 : index
    %c0_146 = arith.constant 0 : index
    %371 = vector.load %arg1[%c0_145, %c0_146] : memref<16x1xf32, #tpu.memory_space<vmem>>, vector<16x1xf32>
    %372 = vector.broadcast %371 : vector<16x1xf32> to vector<16x32xf32>
    %373 = arith.mulf %370, %372 : vector<16x32xf32>
    %c0_147 = arith.constant 0 : index
    %c0_148 = arith.constant 0 : index
    %374 = vector.load %arg6[%c0_147, %c0_148] : memref<16x32xf32, #tpu.memory_space<vmem>>, vector<16x32xf32>
    tpu.vector_store %arg6[%c0_147, %c0_148], %373 {strides = array<i32>} : memref<16x32xf32, #tpu.memory_space<vmem>>, vector<16x32xf32>,
    return
  }
}

</mosaic_0001>

<bundles_post_ra>
// kernel: encoder_forward.1
= control target key start
LH: loop header
LB: loop body
LE: loop exit
PB: predicated region body
PF: predicated region fallthrough
CT: control target
= control target key end

     0   :  { %vm39_vm0 = vcmask 261120   ;;  %s3584_s0 = inlined_call_operand.vmem [shape: f32[16,32], index: 0, kind: input, shape index: {}]   ;;  %s3585_s1 = inlined_call_operand.vmem [shape: f32[16,1], index: 1, kind: input, shape index: {}]   ;;  %s3586_s2 = inlined_call_operand.vmem [shape: f32[3,32,32], index: 2, kind: input, shape index: {}]   ;;  %s3587_s3 = inlined_call_operand.vmem [shape: f32[3,32,32], index: 3, kind: input, shape index: {}]   ;;  %s3588_s4 = inlined_call_operand.vmem [shape: f32[3,1,32], index: 4, kind: input, shape index: {}]   ;;  %s3589_s5 = inlined_call_operand.vmem [shape: f32[1,32], index: 5, kind: input, shape index: {}]   ;;  %s3590_s6 = inlined_call_operand.vmem [shape: f32[16,32], index: 6, kind: output, shape index: {0}]   ;;  %s3591_s7 = inlined_call_operand.hbm [shape: f32[2,32], index: 7, kind: output, shape index: {1}]  }
   0x1   :  { %v31_v0 = vld [vmem:[%s3586_s2 + $0x18] sm:$0xff]  ;;  %v30_v1 = vld [vmem:[%s3586_s2 + $0x10] sm:$0xff]  ;;  %v29_v4 = vld [vmem:[%s3586_s2 + $0x8] sm:$0xff] }
   0x2   :  { %v2371_v2 = vld [vmem:[%s3586_s2 + $0x38] sm:$0xff]  ;;  %2582 = vmatprep.subr.mxu0 %v31_v0  ;;  %v2370_v3 = vld [vmem:[%s3586_s2 + $0x30] sm:$0xff]  ;;  %v2369_v5 = vld [vmem:[%s3586_s2 + $0x28] sm:$0xff] }
   0x3   :  { %2593 = vmatprep.subr.mxu1 %v2371_v2  ;;  %2583 = vmatpush3.msra.mxu0 %v31_v0  ;;  %v26_v6 = vld [vmem:[%s3584_s0] sm:$0xff]  ;;  %v27_v9 = vld [vmem:[%s3584_s0 + $0x8] sm:$0xff]  ;;  %v2379_v10 = vld [vmem:[%s3586_s2 + $0x58] sm:$0xff] }
   0x4   :  { %2594 = vmatpush3.msra.mxu1 %v2371_v2  ;;  %2584 = vmatprep.subr.mxu0 %v30_v1  ;;  %v28_v7 = vld [vmem:[%s3586_s2] sm:$0xff]  ;;  %v2378_v11 = vld [vmem:[%s3586_s2 + $0x50] sm:$0xff]  ;;  %v3077_v12 = vld [vmem:[%s3587_s3 + $0x18] sm:$0xff] }
   0x5   :  { %2595 = vmatprep.subr.mxu1 %v2370_v3  ;;  %2585 = vmatpush3.msra.mxu0 %v30_v1  ;;  %v2368_v8 = vld [vmem:[%s3586_s2 + $0x20] sm:$0xff]  ;;  %v2377_v13 = vld [vmem:[%s3586_s2 + $0x48] sm:$0xff] }
   0x6   :  { %2596 = vmatpush3.msra.mxu1 %v2370_v3  ;;  %2586 = vmatprep.subr.mxu0 %v29_v4 }
   0x7   :  { %2597 = vmatprep.subr.mxu1 %v2369_v5  ;;  %2587 = vmatpush3.msra.mxu0 %v29_v4 }
   0x8   :  { %2590 = vmatprep.mubr.msk.f32.mxu0 %vm39_vm0, %v26_v6  ;;  %2588 = vmatprep.subr.mxu0 %v28_v7 }
   0x9   :  { %2598 = vmatpush3.msra.mxu1 %v2369_v5  ;;  %2589 = vmatpush3.msra.mxu0 %v28_v7 }
   0xa   :  { %2599 = vmatprep.subr.mxu1 %v2368_v8  ;;  %2591 = vmatmul.mubr.msk.f32.vlgmr.msra.gmra.mxu0 %vm39_vm0, %v27_v9 }
   0xb   :  { %2604 = vmatprep.subr.mxu0 %v2379_v10  ;;  %2600 = vmatpush3.msra.mxu1 %v2368_v8 }
   0xc   :  { %2605 = vmatpush3.msra.mxu0 %v2379_v10  ;;  %2601 = vmatprep.mubr.msk.f32.mxu1 %vm39_vm0, %v26_v6 }
   0xd   :  { %2606 = vmatprep.subr.mxu0 %v2378_v11 }
   0xe   :  { %13 = vsyncpa [#allocation6], 0  ;;  %v2992_v14 = vmov 0.0   ;;  %2602 = vmatmul.mubr.msk.f32.vlgmr.msra.gmra.mxu1 %vm39_vm0, %v27_v9  ;;  %v3088_v15 = vld [vmem:[%s3587_s3 + $0x10] sm:$0xff]  ;;  %2607 = vmatpush3.msra.mxu0 %v2378_v11  ;;  %v2376_v16 = vld [vmem:[%s3586_s2 + $0x40] sm:$0xff]  ;;  %vm2993_vm1 = vmmov 0  }
   0xf   :  { %2615 = vmatprep.subr.mxu1 %v2992_v14  ;;  %2608 = vmatprep.subr.mxu0 %v2377_v13  ;;  %v3098_v17 = vld [vmem:[%s3587_s3 + $0x8] sm:$0xff]  ;;  %v3106_v18 = vld [vmem:[%s3587_s3] sm:$0xff]  ;;  %v3113_v19 = vld [vmem:[%s3587_s3 + $0x38] sm:$0xff]  ;;  %v2994_v29 = vmov 0   ;;  %vm562_vm6 = vcmask 254976  }
  0x10   :  { %2616 = vmatpush3.msra.mxu1 %v3077_v12  ;;  %2609 = vmatpush3.msra.mxu0 %v2377_v13  ;;  %v3123_v20 = vld [vmem:[%s3587_s3 + $0x30] sm:$0xff]  ;;  %v3130_v21 = vld [vmem:[%s3587_s3 + $0x58] sm:$0xff]  ;;  %v3136_v22 = vld [vmem:[%s3587_s3 + $0x28] sm:$0xff] }
  0x11   :  { %2617 = vmatprep.subr.mxu1 %v2992_v14  ;;  %2610 = vmatprep.subr.mxu0 %v2376_v16  ;;  %v321_v23 = vld [vmem:[%s3585_s1] sm:$0x3]  ;;  %v3148_v24 = vld [vmem:[%s3587_s3 + $0x50] sm:$0xff]  ;;  %v3162_v26 = vld [vmem:[%s3587_s3 + $0x48] sm:$0xff] }
  0x12   :  { %2618 = vmatpush3.msra.mxu1 %v3088_v15  ;;  %2611 = vmatpush3.msra.mxu0 %v2376_v16  ;;  %v3154_v25 = vld [vmem:[%s3587_s3 + $0x20] sm:$0xff]  ;;  %vm564_vm2 = vcmp.gt.f32.partialorder %v321_v23, 0.5  ;;  %v2416_v31 = vld [vmem:[%s3585_s1 + $0x8] sm:$0x3]  ;;  %v2430_v33 = vld [vmem:[%s3585_s1 + $0xc] sm:$0x3] }
  0x13   :  { %2619 = vmatprep.subr.mxu1 %v2992_v14  ;;  %2612 = vmatprep.mubr.msk.f32.mxu0 %vm39_vm0, %v26_v6  ;;  %v2395_v27 = vld [vmem:[%s3585_s1 + $0x2] sm:$0x3]  ;;  %v565_v30 = vsel %vm564_vm2, 1, %v2994_v29  ;;  %vm1568_vm4 = vcmp.gt.f32.partialorder %v2416_v31, 0.5  ;;  %vm2070_vm5 = vcmp.gt.f32.partialorder %v2430_v33, 0.5 }
  0x14   :  { %2620 = vmatpush3.msra.mxu1 %v3098_v17  ;;  %2626 = vmatprep.subr.mxu0 %v2992_v14  ;;  %v3174_v28 = vld [vmem:[%s3587_s3 + $0x40] sm:$0xff]  ;;  %vm815_vm3 = vcmp.gt.f32.partialorder %v2395_v27, 0.5  ;;  %v1569_v34 = vsel %vm1568_vm4, 1, %v2994_v29  ;;  %v2071_v35 = vsel %vm2070_vm5, 1, %v2994_v29 }
  0x15   :  { %2621 = vmatprep.subr.mxu1 %v2992_v14  ;;  %2613 = vmatmul.mubr.msk.f32.vlgmr.msra.gmra.mxu0 %vm39_vm0, %v27_v9  ;;  %v816_v32 = vsel %vm815_vm3, 1, %v2994_v29  ;;  %v2331_v36 = vld [vmem:[%s3585_s1] sm:$0xff] }
  0x16   :  { %2622 = vmatpush3.msra.mxu1 %v3106_v18  ;;  %2623 = vmatprep.mubr.msk.f32.mxu1 %vm2993_vm1, %v2992_v14  ;;  %v2365_v37 = vld [vmem:[%s3588_s4] ss:$0 sm:$0xff]  ;;  %v2373_v40 = vld [vmem:[%s3588_s4 + $0x1] ss:$0 sm:$0xff]  ;;  %v2381_v47 = vld [vmem:[%s3588_s4 + $0x2] ss:$0 sm:$0xff] }
  0x17   :  { %2627 = vmatpush3.msra.mxu0 %v3113_v19  ;;  %2624 = vmatmul.mubr.f32.vlgmr.msra.gmra.mxu1 %v2992_v14  ;;  %v3238_v3 = vld [vmem:[%s3589_s5] ss:$0 sm:$0xff]  ;;  %v2409_v33 = vld [vmem:[%s3585_s1 + $0x6] sm:$0x3] }
  0x18   :  { %2628 = vmatprep.subr.mxu0 %v2992_v14  ;;  %2634 = vmatprep.mubr.msk.f32.mxu0 %vm2993_vm1, %v2992_v14  ;;  %vm1317_vm9 = vcmp.gt.f32.partialorder %v2409_v33, 0.5 }
  0x19   :  { %2629 = vmatpush3.msra.mxu0 %v3123_v20  ;;  %2637 = vmatprep.subr.mxu1 %v2992_v14 }
  0x1a   :  { %2630 = vmatprep.subr.mxu0 %v2992_v14  ;;  %2638 = vmatpush3.msra.mxu1 %v3130_v21 }
  0x1b   :  { %2631 = vmatpush3.msra.mxu0 %v3136_v22  ;;  %2639 = vmatprep.subr.mxu1 %v2992_v14 }
  0x1c   :  { %2632 = vmatprep.subr.mxu0 %v2992_v14  ;;  %2640 = vmatpush3.msra.mxu1 %v3148_v24 }
  0x1d   :  { %2633 = vmatpush3.msra.mxu0 %v3154_v25  ;;  %2641 = vmatprep.subr.mxu1 %v2992_v14 }
  0x1e   :  { %2635 = vmatmul.mubr.f32.vlgmr.msra.gmra.mxu0 %v2992_v14  ;;  %2642 = vmatpush3.msra.mxu1 %v3162_v26 }
  0x1f   :  { %2643 = vmatprep.subr.mxu1 %v2992_v14  ;;  %2645 = vmatprep.mubr.msk.f32.mxu1 %vm2993_vm1, %v2992_v14 }
  0x20   :  { %2644 = vmatpush3.msra.mxu1 %v3174_v28  ;;  %2883 = vset.pattern.permute.xlu0 %v2994_v29 }
  0x21   :  { %2646 = vmatmul.mubr.f32.vlgmr.msra.gmra.mxu1 %v2992_v14  ;;  %567 = vperm.xlu0 %2883, %v565_v30  }
  0x22   :  { %2648 = vmatprep.subr.mxu0 %v2992_v14  ;;  %2659 = vmatprep.subr.mxu1 %v2992_v14 }
  0x23   :  { %2649 = vmatpush3.msra.mxu0 %v3077_v12  ;;  %2660 = vmatpush3.msra.mxu1 %v3113_v19 }
  0x24   :  { %2650 = vmatprep.subr.mxu0 %v2992_v14  ;;  %2661 = vmatprep.subr.mxu1 %v2992_v14 }
  0x25   :  { %818 = vperm.xlu0 %2883, %v816_v32   ;;  %2651 = vmatpush3.msra.mxu0 %v3088_v15  ;;  %v2402_v32 = vld [vmem:[%s3585_s1 + $0x4] sm:$0x3] }
  0x26   :  { %2652 = vmatprep.subr.mxu0 %v2992_v14  ;;  %2662 = vmatpush3.msra.mxu1 %v3123_v20  ;;  %vm1066_vm8 = vcmp.gt.f32.partialorder %v2402_v32, 0.5 }
  0x27   :  { %2653 = vmatpush3.msra.mxu0 %v3098_v17  ;;  %2663 = vmatprep.subr.mxu1 %v2992_v14 }
  0x28   :  { %2654 = vmatprep.subr.mxu0 %v2992_v14  ;;  %2664 = vmatpush3.msra.mxu1 %v3136_v22 }
  0x29   :  { %1571 = vperm.xlu0 %2883, %v1569_v34   ;;  %2655 = vmatpush3.msra.mxu0 %v3106_v18  ;;  %v1067_v34 = vsel %vm1066_vm8, 1, %v2994_v29 }
  0x2a   :  { %2665 = vmatprep.subr.mxu1 %v2992_v14  ;;  %2656 = vmatprep.mubr.msk.f32.mxu0 %vm2993_vm1, %v2992_v14 }
  0x2b   :  { %2666 = vmatpush3.msra.mxu1 %v3154_v25  ;;  %2667 = vmatprep.mubr.msk.f32.mxu1 %vm2993_vm1, %v2992_v14 }
  0x2c   :  { %2670 = vmatprep.subr.mxu0 %v2992_v14  ;;  %2681 = vmatprep.subr.mxu1 %v2992_v14 }
  0x2d   :  { %2073 = vperm.xlu0 %2883, %v2071_v35   ;;  %2884 = vset.pattern.permute.xlu1 %v2994_v29  ;;  %v2423_v35 = vld [vmem:[%s3585_s1 + $0xa] sm:$0x3] }
  0x2e   :  { %1069 = vperm.xlu1 %2884, %v1067_v34   ;;  %vm1819_vm10 = vcmp.gt.f32.partialorder %v2423_v35, 0.5 }
  0x31   :  { %2335 = vperm.xlu0 %2883, %v2331_v36   ;;  %v1318_v36 = vsel %vm1317_vm9, 1, %v2994_v29 }
  0x32   :  { %1320 = vperm.xlu1 %2884, %v1318_v36  }
  0x9c   :  { %v568_v16 = vpop.permute.xlu0 %567 }
  0x9d   :  { %vm569_vm7 = vcmp.eq.s32.totalorder %v568_v16, 1 }
  0xca   :  { %v2592_v38 = vpop.f32.mrf.mxu0 }
  0xcb   :  { %v118_v39 = vadd.f32 %v2592_v38, %v2365_v37  ;;  %v1820_v38 = vsel %vm1819_vm10, 1, %v2994_v29 }
  0xcc   :  { %v112_v41 = vpop.f32.mrf.mxu0  ;;  %1822 = vperm.xlu1 %2884, %v1820_v38  }
  0xcd   :  { %122 = vst.msk [vmem:[#allocation2 + $0x8] sm:$0xff] %vm39_vm0, %v118_v39  ;;  %v113_v42 = vadd.f32 %v2365_v37, %v112_v41  ;;  %v2437_v37 = vld [vmem:[%s3585_s1 + $0xe] sm:$0x3] }
  0xce   :  { %v2603_v43 = vpop.f32.mrf.mxu1  ;;  %vm2321_vm11 = vcmp.gt.f32.partialorder %v2437_v37, 0.5 }
  0xcf   :  { %v208_v44 = vadd.f32 %v2603_v43, %v2373_v40  ;;  %121 = vst.msk [vmem:[#allocation2] sm:$0xff] %vm39_vm0, %v113_v42  ;;  %v2322_v39 = vsel %vm2321_vm11, 1, %v2994_v29 }
  0xd0   :  { %v202_v45 = vpop.f32.mrf.mxu1  ;;  %2324 = vperm.xlu1 %2884, %v2322_v39  }
  0xd1   :  { %212 = vst.msk [vmem:[#allocation3 + $0x8] sm:$0xff] %vm39_vm0, %v208_v44  ;;  %v203_v46 = vadd.f32 %v2373_v40, %v202_v45  ;;  %v2332_v40 = vld [vmem:[%s3585_s1 + $0x8] sm:$0xff] }
  0xd3   :  { %211 = vst.msk [vmem:[#allocation3] sm:$0xff] %vm39_vm0, %v203_v46 }
  0xd4   :  { %2340 = vperm.xlu1 %2884, %v2332_v40  }
  0xd5   :  { %v2614_v48 = vpop.f32.mrf.mxu0 }
  0xd6   :  { %v298_v49 = vadd.f32 %v2614_v48, %v2381_v47  ;;  %v318_v50 = vld [vmem:[#allocation2] sm:$0x3]  ;;  %v572_v41 = vld [vmem:[#allocation2 + $0x2] sm:$0x3] }
  0xd7   :  { %v391_v51 = vpop.f32.mrf.mxu1  ;;  %v292_v52 = vpop.f32.mrf.mxu0 }
  0xd8   :  { %v541_v53 = vadd.f32 %v391_v51, %v318_v50  ;;  %302 = vst.msk [vmem:[#allocation4 + $0x8] sm:$0xff] %vm39_vm0, %v298_v49  ;;  %v293_v54 = vadd.f32 %v2381_v47, %v292_v52 }
  0xd9   :  { %v2625_v55 = vpop.f32.mrf.mxu1 }
  0xda   :  { %v2393_v56 = vmul.f32 -1.442695, %v541_v53  ;;  %301 = vst.msk [vmem:[#allocation4] sm:$0xff] %vm39_vm0, %v293_v54  ;;  %v319_v57 = vld [vmem:[#allocation3] sm:$0x3] }
  0xdb   :  { %v574_v48 = vld [vmem:[#allocation3 + $0x2] sm:$0x3]  ;;  %v825_v16 = vld [vmem:[#allocation3 + $0x4] sm:$0x3] }
  0xdc   :  { %2885 = vpow2.f32 %v2393_v56 }
  0xde   :  { %v461_v58 = vpop.f32.mrf.mxu0 }
  0xdf   :  { %v548_v59 = vadd.f32 %v461_v58, %v319_v57 }
  0xe0   :  { %v2636_v60 = vpop.f32.mrf.mxu0 }
  0xe1   :  { %v537_v61 = vpop.f32.mrf.mxu1  ;;  %v2394_v62 = vmul.f32 -1.442695, %v548_v59  ;;  %v320_v8 = vld [vmem:[#allocation4] sm:$0x3]  ;;  %v576_v59 = vld [vmem:[#allocation4 + $0x2] sm:$0x3] }
  0xe2   :  { %v538_v5 = vadd.f32 %v3238_v3, %v537_v61  ;;  %v827_v39 = vld [vmem:[#allocation4 + $0x4] sm:$0x3] }
  0xe3   :  { %v2647_v63 = vpop.f32.mrf.mxu1  ;;  %2887 = vpow2.f32 %v2394_v62 }
  0xe9   :  { %v2886_v0 = vpop.eup %2885 }
  0xea   :  { %v545_v1 = vadd.f32 1.0, %v2886_v0 }
  0xec   :  { %2889 = vrcp.f32 %v545_v1 }
  0xf0   :  { %v2888_v2 = vpop.eup %2887 }
  0xf1   :  { %v552_v4 = vadd.f32 1.0, %v2888_v2  ;;  %v819_v2 = vpop.permute.xlu0 %818 }
  0xf2   :  { %vm820_vm12 = vcmp.eq.s32.totalorder %v819_v2, 1 }
  0xf3   :  { %2891 = vrcp.f32 %v552_v4 }
  0xf9   :  { %v2890_v6 = vpop.eup %2889 }
  0xfa   :  { %v555_v7 = vmul.f32 %v2890_v6, %v538_v5  ;;  %v823_v6 = vld [vmem:[#allocation2 + $0x4] sm:$0x3] }
  0xfc   :  { %v556_v9 = vadd.f32 %v555_v7, %v320_v8 }
  0xfe   :  { %2893 = vtanh.f32 %v556_v9 }
 0x100   :  { %v2892_v10 = vpop.eup %2891 }
 0x101   :  { %v558_v11 = vsub.f32 1.0, %v2892_v10  ;;  %v560_v27 = vmul.f32 0.0, %v2892_v10 }
 0x10b   :  { %v2894_v13 = vpop.eup %2893 }
 0x10c   :  { %v559_v23 = vmul.f32 %v2894_v13, %v558_v11 }
 0x10e   :  { %v561_v30 = vadd.f32 %v560_v27, %v559_v23 }
 0x110   :  { %563 = vst.msk [vmem:[%s3590_s6] sm:$0x3] %vm562_vm6, %v561_v30  ;;  %v3245_v31 = vsel %vm569_vm7, %v561_v30, 0.0 }
 0x111   :  { %2657 = vmatmul.mubr.msk.f32.vlgmr.msra.gmra.mxu0 %vm39_vm0, %v3245_v31  ;;  %2668 = vmatmul.mubr.msk.f32.vlgmr.msra.gmra.mxu1 %vm39_vm0, %v3245_v31 }
 0x112   :  { %2671 = vmatpush3.msra.mxu0 %v3130_v21  ;;  %2678 = vmatprep.mubr.msk.f32.mxu0 %vm2993_vm1, %v2992_v14 }
 0x113   :  { %2672 = vmatprep.subr.mxu0 %v2992_v14  ;;  %2682 = vmatpush3.msra.mxu1 %v3077_v12 }
 0x114   :  { %2673 = vmatpush3.msra.mxu0 %v3148_v24  ;;  %2683 = vmatprep.subr.mxu1 %v2992_v14 }
 0x115   :  { %2674 = vmatprep.subr.mxu0 %v2992_v14  ;;  %2684 = vmatpush3.msra.mxu1 %v3088_v15 }
 0x116   :  { %2675 = vmatpush3.msra.mxu0 %v3162_v26  ;;  %2685 = vmatprep.subr.mxu1 %v2992_v14 }
 0x117   :  { %2676 = vmatprep.subr.mxu0 %v2992_v14  ;;  %2686 = vmatpush3.msra.mxu1 %v3098_v17 }
 0x118   :  { %2677 = vmatpush3.msra.mxu0 %v3174_v28  ;;  %2687 = vmatprep.subr.mxu1 %v2992_v14 }
 0x119   :  { %2679 = vmatmul.mubr.msk.f32.vlgmr.msra.gmra.mxu0 %vm39_vm0, %v3245_v31  ;;  %2692 = vmatprep.subr.mxu0 %v2992_v14 }
 0x11a   :  { %2693 = vmatpush3.msra.mxu0 %v3113_v19  ;;  %2688 = vmatpush3.msra.mxu1 %v3106_v18 }
 0x11b   :  { %2694 = vmatprep.subr.mxu0 %v2992_v14  ;;  %2689 = vmatprep.mubr.msk.f32.mxu1 %vm2993_vm1, %v2992_v14 }
 0x11c   :  { %2695 = vmatpush3.msra.mxu0 %v3123_v20  ;;  %2700 = vmatprep.mubr.msk.f32.mxu0 %vm2993_vm1, %v2992_v14 }
 0x11d   :  { %2696 = vmatprep.subr.mxu0 %v2992_v14  ;;  %2703 = vmatprep.subr.mxu1 %v2992_v14 }
 0x11e   :  { %2697 = vmatpush3.msra.mxu0 %v3136_v22 }
 0x11f   :  { %2698 = vmatprep.subr.mxu0 %v2992_v14 }
 0x120   :  { %2699 = vmatpush3.msra.mxu0 %v3154_v25 }
 0x121   :  { %2714 = vmatprep.subr.mxu0 %v2992_v14 }
 0x1d1   :  { %v648_v42 = vpop.f32.mrf.mxu0  ;;  %v718_v43 = vpop.f32.mrf.mxu1 }
 0x1d2   :  { %v792_v44 = vadd.f32 %v648_v42, %v572_v41  ;;  %v799_v49 = vadd.f32 %v718_v43, %v574_v48 }
 0x1d3   :  { %v2658_v45 = vpop.f32.mrf.mxu0  ;;  %v2669_v46 = vpop.f32.mrf.mxu1 }
 0x1d4   :  { %v2399_v47 = vmul.f32 -1.442695, %v792_v44  ;;  %v2400_v52 = vmul.f32 -1.442695, %v799_v49  ;;  %v1070_v44 = vpop.permute.xlu1 %1069  ;;  %v1074_v49 = vld [vmem:[#allocation2 + $0x6] sm:$0x3] }
 0x1d5   :  { %vm1071_vm13 = vcmp.eq.s32.totalorder %v1070_v44, 1 }
 0x1d6   :  { %2895 = vpow2.f32 %v2399_v47 }
 0x1d7   :  { %2897 = vpow2.f32 %v2400_v52 }
 0x1d9   :  { %v788_v50 = vpop.f32.mrf.mxu0 }
 0x1da   :  { %v789_v56 = vadd.f32 %v3238_v3, %v788_v50 }
 0x1db   :  { %v2680_v51 = vpop.f32.mrf.mxu0 }
 0x1e3   :  { %v2896_v29 = vpop.eup %2895 }
 0x1e4   :  { %v796_v53 = vadd.f32 1.0, %v2896_v29  ;;  %v2898_v54 = vpop.eup %2897 }
 0x1e5   :  { %v803_v55 = vadd.f32 1.0, %v2898_v54 }
 0x1e6   :  { %2899 = vrcp.f32 %v796_v53 }
 0x1e7   :  { %2901 = vrcp.f32 %v803_v55  ;;  %v1076_v55 = vld [vmem:[#allocation3 + $0x6] sm:$0x3] }
 0x1f3   :  { %v2900_v57 = vpop.eup %2899 }
 0x1f4   :  { %v806_v58 = vmul.f32 %v2900_v57, %v789_v56  ;;  %v2902_v61 = vpop.eup %2901 }
 0x1f5   :  { %v809_v62 = vsub.f32 1.0, %v2902_v61  ;;  %v811_v1 = vmul.f32 %v2902_v61, %v3245_v31 }
 0x1f6   :  { %v807_v60 = vadd.f32 %v806_v58, %v576_v59 }
 0x1f8   :  { %2903 = vtanh.f32 %v807_v60 }
 0x205   :  { %v2904_v63 = vpop.eup %2903 }
 0x206   :  { %v810_v0 = vmul.f32 %v2904_v63, %v809_v62 }
 0x208   :  { %v812_v4 = vadd.f32 %v811_v1, %v810_v0 }
 0x20a   :  { %2401 = vst.msk [vmem:[%s3590_s6 + $0x2] sm:$0x3] %vm562_vm6, %v812_v4  ;;  %v3309_v5 = vsel %vm820_vm12, %v812_v4, %v3245_v31  ;;  %v1078_v4 = vld [vmem:[#allocation4 + $0x6] sm:$0x3] }
 0x20b   :  { %2690 = vmatmul.mubr.msk.f32.vlgmr.msra.gmra.mxu1 %vm39_vm0, %v3309_v5  ;;  %2701 = vmatmul.mubr.msk.f32.vlgmr.msra.gmra.mxu0 %vm39_vm0, %v3309_v5 }
 0x20c   :  { %2704 = vmatpush3.msra.mxu1 %v3130_v21  ;;  %2711 = vmatprep.mubr.msk.f32.mxu1 %vm2993_vm1, %v2992_v14 }
 0x20d   :  { %2705 = vmatprep.subr.mxu1 %v2992_v14  ;;  %2715 = vmatpush3.msra.mxu0 %v3077_v12 }
 0x20e   :  { %2706 = vmatpush3.msra.mxu1 %v3148_v24  ;;  %2716 = vmatprep.subr.mxu0 %v2992_v14 }
 0x20f   :  { %2707 = vmatprep.subr.mxu1 %v2992_v14  ;;  %2717 = vmatpush3.msra.mxu0 %v3088_v15 }
 0x210   :  { %2708 = vmatpush3.msra.mxu1 %v3162_v26  ;;  %2718 = vmatprep.subr.mxu0 %v2992_v14 }
 0x211   :  { %2709 = vmatprep.subr.mxu1 %v2992_v14  ;;  %2719 = vmatpush3.msra.mxu0 %v3098_v17 }
 0x212   :  { %2710 = vmatpush3.msra.mxu1 %v3174_v28  ;;  %2720 = vmatprep.subr.mxu0 %v2992_v14 }
 0x213   :  { %2712 = vmatmul.mubr.msk.f32.vlgmr.msra.gmra.mxu1 %vm39_vm0, %v3309_v5  ;;  %2725 = vmatprep.subr.mxu1 %v2992_v14 }
 0x214   :  { %2726 = vmatpush3.msra.mxu1 %v3113_v19  ;;  %2721 = vmatpush3.msra.mxu0 %v3106_v18 }
 0x215   :  { %2727 = vmatprep.subr.mxu1 %v2992_v14  ;;  %2722 = vmatprep.mubr.msk.f32.mxu0 %vm2993_vm1, %v2992_v14 }
 0x216   :  { %2728 = vmatpush3.msra.mxu1 %v3123_v20  ;;  %2733 = vmatprep.mubr.msk.f32.mxu1 %vm2993_vm1, %v2992_v14 }
 0x217   :  { %2729 = vmatprep.subr.mxu1 %v2992_v14  ;;  %2736 = vmatprep.subr.mxu0 %v2992_v14 }
 0x218   :  { %2730 = vmatpush3.msra.mxu1 %v3136_v22 }
 0x219   :  { %2731 = vmatprep.subr.mxu1 %v2992_v14 }
 0x21a   :  { %2732 = vmatpush3.msra.mxu1 %v3154_v25 }
 0x21b   :  { %2747 = vmatprep.subr.mxu1 %v2992_v14 }
 0x2cb   :  { %v899_v7 = vpop.f32.mrf.mxu1  ;;  %v969_v8 = vpop.f32.mrf.mxu0 }
 0x2cc   :  { %v1043_v9 = vadd.f32 %v899_v7, %v823_v6  ;;  %v1050_v23 = vadd.f32 %v969_v8, %v825_v16 }
 0x2cd   :  { %v2691_v10 = vpop.f32.mrf.mxu1  ;;  %v2702_v11 = vpop.f32.mrf.mxu0 }
 0x2ce   :  { %v2406_v13 = vmul.f32 -1.442695, %v1043_v9  ;;  %v2407_v31 = vmul.f32 -1.442695, %v1050_v23  ;;  %v3393_v9 = vpop.permute.xlu0 %1571 }
 0x2cf   :  { %vm1573_vm15 = vcmp.eq.s32.totalorder %v3393_v9, 1 }
 0x2d0   :  { %2905 = vpow2.f32 %v2406_v13  ;;  %v1321_v13 = vpop.permute.xlu1 %1320 }
 0x2d1   :  { %2907 = vpow2.f32 %v2407_v31  ;;  %vm1322_vm14 = vcmp.eq.s32.totalorder %v1321_v13, 1 }
 0x2d3   :  { %v1039_v27 = vpop.f32.mrf.mxu1 }
 0x2d4   :  { %v1040_v36 = vadd.f32 %v3238_v3, %v1039_v27  ;;  %v3403_v27 = vpop.permute.xlu0 %2073 }
 0x2d5   :  { %v2713_v30 = vpop.f32.mrf.mxu1  ;;  %vm2075_vm3 = vcmp.eq.s32.totalorder %v3403_v27, 1  ;;  %v2967_v27 = vld [vmem:[%s3587_s3 + $0x50] sm:$0xff] }
 0x2d8   :  { %v2336_v30 = vpop.permute.xlu0 %2335 }
 0x2dd   :  { %v2906_v32 = vpop.eup %2905 }
 0x2de   :  { %v1047_v33 = vadd.f32 1.0, %v2906_v32  ;;  %v2908_v34 = vpop.eup %2907 }
 0x2df   :  { %v1054_v35 = vadd.f32 1.0, %v2908_v34 }
 0x2e0   :  { %2909 = vrcp.f32 %v1047_v33  ;;  %v1325_v33 = vld [vmem:[#allocation2 + $0x8] sm:$0x3] }
 0x2e1   :  { %2911 = vrcp.f32 %v1054_v35 }
 0x2ed   :  { %v2910_v37 = vpop.eup %2909 }
 0x2ee   :  { %v1057_v38 = vmul.f32 %v2910_v37, %v1040_v36  ;;  %v2912_v41 = vpop.eup %2911 }
 0x2ef   :  { %v1060_v42 = vsub.f32 1.0, %v2912_v41  ;;  %v1062_v46 = vmul.f32 %v2912_v41, %v3309_v5 }
 0x2f0   :  { %v1058_v40 = vadd.f32 %v1057_v38, %v827_v39 }
 0x2f2   :  { %2913 = vtanh.f32 %v1058_v40  ;;  %v1327_v40 = vld [vmem:[#allocation3 + $0x8] sm:$0x3] }
 0x2ff   :  { %v2914_v43 = vpop.eup %2913 }
 0x300   :  { %v1061_v45 = vmul.f32 %v2914_v43, %v1060_v42 }
 0x302   :  { %v1063_v47 = vadd.f32 %v1062_v46, %v1061_v45 }
 0x304   :  { %2408 = vst.msk [vmem:[%s3590_s6 + $0x4] sm:$0x3] %vm562_vm6, %v1063_v47  ;;  %v3354_v48 = vsel %vm1071_vm13, %v1063_v47, %v3309_v5 }
 0x305   :  { %2723 = vmatmul.mubr.msk.f32.vlgmr.msra.gmra.mxu0 %vm39_vm0, %v3354_v48  ;;  %2734 = vmatmul.mubr.msk.f32.vlgmr.msra.gmra.mxu1 %vm39_vm0, %v3354_v48 }
 0x306   :  { %2737 = vmatpush3.msra.mxu0 %v3130_v21  ;;  %2744 = vmatprep.mubr.msk.f32.mxu0 %vm2993_vm1, %v2992_v14 }
 0x307   :  { %2738 = vmatprep.subr.mxu0 %v2992_v14  ;;  %2748 = vmatpush3.msra.mxu1 %v3077_v12 }
 0x308   :  { %2739 = vmatpush3.msra.mxu0 %v3148_v24  ;;  %2749 = vmatprep.subr.mxu1 %v2992_v14 }
 0x309   :  { %2740 = vmatprep.subr.mxu0 %v2992_v14  ;;  %2750 = vmatpush3.msra.mxu1 %v3088_v15 }
 0x30a   :  { %2741 = vmatpush3.msra.mxu0 %v3162_v26  ;;  %2751 = vmatprep.subr.mxu1 %v2992_v14 }
 0x30b   :  { %2742 = vmatprep.subr.mxu0 %v2992_v14  ;;  %2752 = vmatpush3.msra.mxu1 %v3098_v17 }
 0x30c   :  { %2743 = vmatpush3.msra.mxu0 %v3174_v28  ;;  %2753 = vmatprep.subr.mxu1 %v2992_v14 }
 0x30d   :  { %2745 = vmatmul.mubr.msk.f32.vlgmr.msra.gmra.mxu0 %vm39_vm0, %v3354_v48  ;;  %2758 = vmatprep.subr.mxu0 %v2992_v14 }
 0x30e   :  { %2759 = vmatpush3.msra.mxu0 %v3113_v19  ;;  %2754 = vmatpush3.msra.mxu1 %v3106_v18 }
 0x30f   :  { %2760 = vmatprep.subr.mxu0 %v2992_v14  ;;  %2755 = vmatprep.mubr.msk.f32.mxu1 %vm2993_vm1, %v2992_v14 }
 0x310   :  { %2761 = vmatpush3.msra.mxu0 %v3123_v20  ;;  %2766 = vmatprep.mubr.msk.f32.mxu0 %vm2993_vm1, %v2992_v14 }
 0x311   :  { %2762 = vmatprep.subr.mxu0 %v2992_v14  ;;  %2769 = vmatprep.subr.mxu1 %v2992_v14 }
 0x312   :  { %2763 = vmatpush3.msra.mxu0 %v3136_v22 }
 0x313   :  { %2764 = vmatprep.subr.mxu0 %v2992_v14 }
 0x314   :  { %2765 = vmatpush3.msra.mxu0 %v3154_v25 }
 0x315   :  { %2780 = vmatprep.subr.mxu0 %v2992_v14 }
 0x3c5   :  { %v1150_v50 = vpop.f32.mrf.mxu0  ;;  %v1220_v51 = vpop.f32.mrf.mxu1 }
 0x3c6   :  { %v1294_v52 = vadd.f32 %v1150_v50, %v1074_v49  ;;  %v1301_v56 = vadd.f32 %v1220_v51, %v1076_v55 }
 0x3c7   :  { %v2724_v29 = vpop.f32.mrf.mxu0  ;;  %v2735_v53 = vpop.f32.mrf.mxu1 }
 0x3c8   :  { %v2413_v54 = vmul.f32 -1.442695, %v1294_v52  ;;  %v2414_v59 = vmul.f32 -1.442695, %v1301_v56  ;;  %v1329_v52 = vld [vmem:[#allocation4 + $0x8] sm:$0x3] }
 0x3ca   :  { %2915 = vpow2.f32 %v2413_v54 }
 0x3cb   :  { %2917 = vpow2.f32 %v2414_v59 }
 0x3cd   :  { %v1290_v57 = vpop.f32.mrf.mxu0 }
 0x3ce   :  { %v1291_v0 = vadd.f32 %v3238_v3, %v1290_v57 }
 0x3cf   :  { %v2746_v58 = vpop.f32.mrf.mxu0 }
 0x3d7   :  { %v2916_v60 = vpop.eup %2915 }
 0x3d8   :  { %v1298_v61 = vadd.f32 1.0, %v2916_v60  ;;  %v2918_v62 = vpop.eup %2917 }
 0x3d9   :  { %v1305_v63 = vadd.f32 1.0, %v2918_v62 }
 0x3da   :  { %2919 = vrcp.f32 %v1298_v61 }
 0x3db   :  { %2921 = vrcp.f32 %v1305_v63 }
 0x3e7   :  { %v2920_v1 = vpop.eup %2919 }
 0x3e8   :  { %v1308_v2 = vmul.f32 %v2920_v1, %v1291_v0  ;;  %v2922_v6 = vpop.eup %2921 }
 0x3e9   :  { %v1311_v7 = vsub.f32 1.0, %v2922_v6  ;;  %v1313_v11 = vmul.f32 %v2922_v6, %v3354_v48 }
 0x3ea   :  { %v1309_v5 = vadd.f32 %v1308_v2, %v1078_v4  ;;  %v1578_v2 = vld [vmem:[#allocation3 + $0xa] sm:$0x3] }
 0x3ec   :  { %2923 = vtanh.f32 %v1309_v5 }
 0x3f9   :  { %v2924_v8 = vpop.eup %2923 }
 0x3fa   :  { %v1312_v10 = vmul.f32 %v2924_v8, %v1311_v7 }
 0x3fc   :  { %v1314_v16 = vadd.f32 %v1313_v11, %v1312_v10 }
 0x3fe   :  { %2415 = vst.msk [vmem:[%s3590_s6 + $0x6] sm:$0x3] %vm562_vm6, %v1314_v16  ;;  %v3401_v23 = vsel %vm1322_vm14, %v1314_v16, %v3354_v48 }
 0x3ff   :  { %2756 = vmatmul.mubr.msk.f32.vlgmr.msra.gmra.mxu1 %vm39_vm0, %v3401_v23  ;;  %2767 = vmatmul.mubr.msk.f32.vlgmr.msra.gmra.mxu0 %vm39_vm0, %v3401_v23 }
 0x400   :  { %2770 = vmatpush3.msra.mxu1 %v3130_v21  ;;  %2777 = vmatprep.mubr.msk.f32.mxu1 %vm2993_vm1, %v2992_v14 }
 0x401   :  { %2771 = vmatprep.subr.mxu1 %v2992_v14  ;;  %2781 = vmatpush3.msra.mxu0 %v3077_v12 }
 0x402   :  { %2772 = vmatpush3.msra.mxu1 %v3148_v24  ;;  %2782 = vmatprep.subr.mxu0 %v2992_v14 }
 0x403   :  { %2773 = vmatprep.subr.mxu1 %v2992_v14  ;;  %2783 = vmatpush3.msra.mxu0 %v3088_v15 }
 0x404   :  { %2774 = vmatpush3.msra.mxu1 %v3162_v26  ;;  %2784 = vmatprep.subr.mxu0 %v2992_v14 }
 0x405   :  { %v2329_v31 = vld [vmem:[%s3590_s6] sm:$0xff]  ;;  %2775 = vmatprep.subr.mxu1 %v2992_v14  ;;  %2785 = vmatpush3.msra.mxu0 %v3098_v17 }
 0x406   :  { %v2343_v32 = vmul.f32 %v2336_v30, %v2329_v31  ;;  %2776 = vmatpush3.msra.mxu1 %v3174_v28  ;;  %2786 = vmatprep.subr.mxu0 %v2992_v14  ;;  %v1580_v30 = vld [vmem:[#allocation4 + $0xa] sm:$0x3] }
 0x407   :  { %2778 = vmatmul.mubr.msk.f32.vlgmr.msra.gmra.mxu1 %vm39_vm0, %v3401_v23  ;;  %2791 = vmatprep.subr.mxu1 %v2992_v14 }
 0x408   :  { %2345 = vst.msk [vmem:[%s3590_s6] sm:$0xff] %vm39_vm0, %v2343_v32  ;;  %2792 = vmatpush3.msra.mxu1 %v3113_v19  ;;  %2787 = vmatpush3.msra.mxu0 %v3106_v18 }
 0x409   :  { %2793 = vmatprep.subr.mxu1 %v2992_v14  ;;  %2788 = vmatprep.mubr.msk.f32.mxu0 %vm2993_vm1, %v2992_v14 }
 0x40a   :  { %2794 = vmatpush3.msra.mxu1 %v3123_v20  ;;  %2799 = vmatprep.mubr.msk.f32.mxu1 %vm2993_vm1, %v2992_v14 }
 0x40b   :  { %2795 = vmatprep.subr.mxu1 %v2992_v14  ;;  %2802 = vmatprep.subr.mxu0 %v2992_v14 }
 0x40c   :  { %2796 = vmatpush3.msra.mxu1 %v3136_v22 }
 0x40d   :  { %2797 = vmatprep.subr.mxu1 %v2992_v14 }
 0x40e   :  { %2798 = vmatpush3.msra.mxu1 %v3154_v25 }
 0x40f   :  { %2813 = vmatprep.subr.mxu1 %v2992_v14 }
 0x4bf   :  { %v1401_v34 = vpop.f32.mrf.mxu1  ;;  %v1471_v35 = vpop.f32.mrf.mxu0 }
 0x4c0   :  { %v1545_v36 = vadd.f32 %v1401_v34, %v1325_v33  ;;  %v1552_v41 = vadd.f32 %v1471_v35, %v1327_v40  ;;  %v2965_v40 = vld [vmem:[%s3587_s3 + $0x18] sm:$0xff] }
 0x4c1   :  { %v2757_v37 = vpop.f32.mrf.mxu1  ;;  %v2768_v38 = vpop.f32.mrf.mxu0 }
 0x4c2   :  { %v2420_v39 = vmul.f32 -1.442695, %v1545_v36  ;;  %v2421_v44 = vmul.f32 -1.442695, %v1552_v41  ;;  %v1823_v37 = vpop.permute.xlu1 %1822 }
 0x4c3   :  { %vm1824_vm2 = vcmp.eq.s32.totalorder %v1823_v37, 1 }
 0x4c4   :  { %2925 = vpow2.f32 %v2420_v39 }
 0x4c5   :  { %2927 = vpow2.f32 %v2421_v44 }
 0x4c7   :  { %v1541_v42 = vpop.f32.mrf.mxu1 }
 0x4c8   :  { %v1542_v49 = vadd.f32 %v3238_v3, %v1541_v42 }
 0x4c9   :  { %v2779_v43 = vpop.f32.mrf.mxu1 }
 0x4d1   :  { %v2926_v45 = vpop.eup %2925 }
 0x4d2   :  { %v1549_v46 = vadd.f32 1.0, %v2926_v45  ;;  %v2928_v47 = vpop.eup %2927 }
 0x4d3   :  { %v1556_v48 = vadd.f32 1.0, %v2928_v47 }
 0x4d4   :  { %2929 = vrcp.f32 %v1549_v46 }
 0x4d5   :  { %2931 = vrcp.f32 %v1556_v48 }
 0x4e1   :  { %v2930_v50 = vpop.eup %2929 }
 0x4e2   :  { %v1559_v51 = vmul.f32 %v2930_v50, %v1542_v49  ;;  %v2932_v53 = vpop.eup %2931  ;;  %v1831_v49 = vld [vmem:[#allocation4 + $0xc] sm:$0x3] }
 0x4e3   :  { %v1562_v54 = vsub.f32 1.0, %v2932_v53  ;;  %v1564_v57 = vmul.f32 %v2932_v53, %v3401_v23 }
 0x4e4   :  { %v1560_v29 = vadd.f32 %v1559_v51, %v1329_v52 }
 0x4e6   :  { %2933 = vtanh.f32 %v1560_v29 }
 0x4f3   :  { %v2934_v55 = vpop.eup %2933 }
 0x4f4   :  { %v1563_v56 = vmul.f32 %v2934_v55, %v1562_v54 }
 0x4f6   :  { %v1565_v58 = vadd.f32 %v1564_v57, %v1563_v56  ;;  %v2966_v57 = vld [vmem:[%s3587_s3 + $0x58] sm:$0xff] }
 0x4f8   :  { %2422 = vst.msk [vmem:[%s3590_s6 + $0x8] sm:$0x3] %vm562_vm6, %v1565_v58  ;;  %v3456_v59 = vsel %vm1573_vm15, %v1565_v58, %v3401_v23  ;;  %v2968_v58 = vld [vmem:[%s3587_s3 + $0x48] sm:$0xff] }
 0x4f9   :  { %2789 = vmatmul.mubr.msk.f32.vlgmr.msra.gmra.mxu0 %vm39_vm0, %v3456_v59  ;;  %2800 = vmatmul.mubr.msk.f32.vlgmr.msra.gmra.mxu1 %vm39_vm0, %v3456_v59 }
 0x4fa   :  { %2803 = vmatpush3.msra.mxu0 %v3130_v21  ;;  %2810 = vmatprep.mubr.msk.f32.mxu0 %vm2993_vm1, %v2992_v14 }
 0x4fb   :  { %2804 = vmatprep.subr.mxu0 %v2992_v14  ;;  %2814 = vmatpush3.msra.mxu1 %v3077_v12  ;;  %v1576_v12 = vld [vmem:[#allocation2 + $0xa] sm:$0x3] }
 0x4fc   :  { %2805 = vmatpush3.msra.mxu0 %v3148_v24  ;;  %2815 = vmatprep.subr.mxu1 %v2992_v14 }
 0x4fd   :  { %2806 = vmatprep.subr.mxu0 %v2992_v14  ;;  %2816 = vmatpush3.msra.mxu1 %v3088_v15 }
 0x4fe   :  { %2807 = vmatpush3.msra.mxu0 %v3162_v26  ;;  %2817 = vmatprep.subr.mxu1 %v2992_v14 }
 0x4ff   :  { %2808 = vmatprep.subr.mxu0 %v2992_v14  ;;  %2818 = vmatpush3.msra.mxu1 %v3098_v17 }
 0x500   :  { %2809 = vmatpush3.msra.mxu0 %v3174_v28  ;;  %2819 = vmatprep.subr.mxu1 %v2992_v14 }
 0x501   :  { %2811 = vmatmul.mubr.msk.f32.vlgmr.msra.gmra.mxu0 %vm39_vm0, %v3456_v59  ;;  %2824 = vmatprep.subr.mxu0 %v2992_v14 }
 0x502   :  { %2825 = vmatpush3.msra.mxu0 %v3113_v19  ;;  %2820 = vmatpush3.msra.mxu1 %v3106_v18 }
 0x503   :  { %2826 = vmatprep.subr.mxu0 %v2992_v14  ;;  %2821 = vmatprep.mubr.msk.f32.mxu1 %vm2993_vm1, %v2992_v14 }
 0x504   :  { %2827 = vmatpush3.msra.mxu0 %v3123_v20  ;;  %2832 = vmatprep.mubr.msk.f32.mxu0 %vm2993_vm1, %v2992_v14 }
 0x505   :  { %2828 = vmatprep.subr.mxu0 %v2992_v14  ;;  %2835 = vmatprep.subr.mxu1 %v2992_v14 }
 0x506   :  { %2829 = vmatpush3.msra.mxu0 %v3136_v22 }
 0x507   :  { %2830 = vmatprep.subr.mxu0 %v2992_v14 }
 0x508   :  { %2831 = vmatpush3.msra.mxu0 %v3154_v25 }
 0x509   :  { %2846 = vmatprep.subr.mxu0 %v2992_v14 }
 0x5b9   :  { %v1652_v60 = vpop.f32.mrf.mxu0  ;;  %v1722_v61 = vpop.f32.mrf.mxu1 }
 0x5ba   :  { %v1796_v62 = vadd.f32 %v1652_v60, %v1576_v12  ;;  %v1803_v4 = vadd.f32 %v1722_v61, %v1578_v2  ;;  %v2078_v12 = vld [vmem:[#allocation2 + $0xe] sm:$0x3]  ;;  %v2080_v2 = vld [vmem:[#allocation3 + $0xe] sm:$0x3] }
 0x5bb   :  { %v2790_v63 = vpop.f32.mrf.mxu0  ;;  %v2801_v0 = vpop.f32.mrf.mxu1 }
 0x5bc   :  { %v2427_v1 = vmul.f32 -1.442695, %v1796_v62  ;;  %v2428_v7 = vmul.f32 -1.442695, %v1803_v4 }
 0x5be   :  { %2935 = vpow2.f32 %v2427_v1 }
 0x5bf   :  { %2937 = vpow2.f32 %v2428_v7 }
 0x5c1   :  { %v1792_v5 = vpop.f32.mrf.mxu0 }
 0x5c2   :  { %v1793_v13 = vadd.f32 %v3238_v3, %v1792_v5 }
 0x5c3   :  { %v2812_v6 = vpop.f32.mrf.mxu0 }
 0x5cb   :  { %v2936_v8 = vpop.eup %2935 }
 0x5cc   :  { %v1800_v9 = vadd.f32 1.0, %v2936_v8  ;;  %v2938_v10 = vpop.eup %2937 }
 0x5cd   :  { %v1807_v11 = vadd.f32 1.0, %v2938_v10 }
 0x5ce   :  { %2939 = vrcp.f32 %v1800_v9 }
 0x5cf   :  { %2941 = vrcp.f32 %v1807_v11 }
 0x5db   :  { %v2940_v16 = vpop.eup %2939 }
 0x5dc   :  { %v1810_v23 = vmul.f32 %v2940_v16, %v1793_v13  ;;  %v2942_v32 = vpop.eup %2941 }
 0x5dd   :  { %v1813_v33 = vsub.f32 1.0, %v2942_v32  ;;  %v1815_v36 = vmul.f32 %v2942_v32, %v3456_v59 }
 0x5de   :  { %v1811_v31 = vadd.f32 %v1810_v23, %v1580_v30  ;;  %v2082_v23 = vld [vmem:[#allocation4 + $0xe] sm:$0x3] }
 0x5e0   :  { %2943 = vtanh.f32 %v1811_v31 }
 0x5ed   :  { %v2944_v34 = vpop.eup %2943 }
 0x5ee   :  { %v1814_v35 = vmul.f32 %v2944_v34, %v1813_v33 }
 0x5f0   :  { %v1816_v38 = vadd.f32 %v1815_v36, %v1814_v35  ;;  %v2325_v36 = vpop.permute.xlu1 %2324 }
 0x5f2   :  { %2429 = vst.msk [vmem:[%s3590_s6 + $0xa] sm:$0x3] %vm562_vm6, %v1816_v38  ;;  %v3501_v39 = vsel %vm1824_vm2, %v1816_v38, %v3456_v59  ;;  %v2969_v59 = vld [vmem:[%s3587_s3 + $0x40] sm:$0xff]  ;;  %s2995_s3 = smov [#allocation5]  }
 0x5f3   :  { %2822 = vmatmul.mubr.msk.f32.vlgmr.msra.gmra.mxu1 %vm39_vm0, %v3501_v39  ;;  %2833 = vmatmul.mubr.msk.f32.vlgmr.msra.gmra.mxu0 %vm39_vm0, %v3501_v39  ;;  %s2355_s28 = sshll.u32 %s2995_s3, 4  ;;  %s2356_s28 = int_to_ptr.vmem [resolvable:$true] %s2355_s28 }
 0x5f4   :  { %2836 = vmatpush3.msra.mxu1 %v3130_v21  ;;  %2843 = vmatprep.mubr.msk.f32.mxu1 %vm2993_vm1, %v2992_v14  ;;  %s2970_s30 = scalar_lea.vmem %s2356_s28, 32  ;;  %p2975_p1 = scmp.lt.s32.totalorder %s2356_s28, %s2356_s28 }
 0x5f5   :  { %2837 = vmatprep.subr.mxu1 %v2992_v14  ;;  %2847 = vmatpush3.msra.mxu0 %v2965_v40  ;;  %p2971_p0 = scmp.ne.s32.totalorder %s2356_s28, %s2970_s30  ;;  %p2976_p2 = scmp.lt.s32.totalorder %s2970_s30, %s2970_s30 }
 0x5f6   :  { %2838 = vmatpush3.msra.mxu1 %v3148_v24  ;;  %2848 = vmatprep.subr.mxu0 %v2992_v14 }
 0x5f7   :  { %2839 = vmatprep.subr.mxu1 %v2992_v14  ;;  %2849 = vmatpush3.msra.mxu0 %v3088_v15  ;;  %v1827_v15 = vld [vmem:[#allocation2 + $0xc] sm:$0x3]  ;;  %p2977_p3 = por %p2976_p2, %p2975_p1 }
 0x5f8   :  { %2840 = vmatpush3.msra.mxu1 %v3162_v26  ;;  %2850 = vmatprep.subr.mxu0 %v2992_v14  ;;  %v1829_v26 = vld [vmem:[#allocation3 + $0xc] sm:$0x3] }
 0x5f9   :  { %2841 = vmatprep.subr.mxu1 %v2992_v14  ;;  %2851 = vmatpush3.msra.mxu0 %v3098_v17  ;;  %p2978_p4 = pnand %p2977_p3, %p2971_p0 }
 0x5fa   :  { %2842 = vmatpush3.msra.mxu1 %v3174_v28  ;;  %2852 = vmatprep.subr.mxu0 %v2992_v14 }
 0x5fb   :  { %2844 = vmatmul.mubr.msk.f32.vlgmr.msra.gmra.mxu1 %vm39_vm0, %v3501_v39  ;;  %2857 = vmatprep.subr.mxu1 %v2992_v14 }
 0x5fc   :  { %2858 = vmatpush3.msra.mxu1 %v3113_v19  ;;  %2853 = vmatpush3.msra.mxu0 %v3106_v18 }
 0x5fd   :  { %2859 = vmatprep.subr.mxu1 %v2992_v14  ;;  %2854 = vmatprep.mubr.msk.f32.mxu0 %vm2993_vm1, %v2992_v14 }
 0x5fe   :  { %2860 = vmatpush3.msra.mxu1 %v3123_v20  ;;  %2865 = vmatprep.mubr.msk.f32.mxu1 %vm2993_vm1, %v2992_v14 }
 0x5ff   :  { %2861 = vmatprep.subr.mxu1 %v2992_v14  ;;  %2868 = vmatprep.subr.mxu0 %v2992_v14 }
 0x600   :  { %2862 = vmatpush3.msra.mxu1 %v3136_v22 }
 0x601   :  { %2863 = vmatprep.subr.mxu1 %v2992_v14 }
 0x602   :  { %2864 = vmatpush3.msra.mxu1 %v3154_v25 }
 0x6b3   :  { %v1903_v17 = vpop.f32.mrf.mxu1  ;;  %v1973_v18 = vpop.f32.mrf.mxu0 }
 0x6b4   :  { %v2047_v19 = vadd.f32 %v1903_v17, %v1827_v15  ;;  %v2054_v28 = vadd.f32 %v1973_v18, %v1829_v26 }
 0x6b5   :  { %v2823_v21 = vpop.f32.mrf.mxu1  ;;  %v2834_v24 = vpop.f32.mrf.mxu0 }
 0x6b6   :  { %v2434_v20 = vmul.f32 -1.442695, %v2047_v19  ;;  %v2435_v43 = vmul.f32 -1.442695, %v2054_v28 }
 0x6b8   :  { %2945 = vpow2.f32 %v2434_v20 }
 0x6b9   :  { %2947 = vpow2.f32 %v2435_v43 }
 0x6bb   :  { %v2043_v41 = vpop.f32.mrf.mxu1 }
 0x6bc   :  { %v2044_v25 = vadd.f32 %v3238_v3, %v2043_v41 }
 0x6bd   :  { %v2845_v42 = vpop.f32.mrf.mxu1 }
 0x6c5   :  { %v2946_v44 = vpop.eup %2945 }
 0x6c6   :  { %v2051_v22 = vadd.f32 1.0, %v2946_v44  ;;  %v2948_v45 = vpop.eup %2947 }
 0x6c7   :  { %v2058_v46 = vadd.f32 1.0, %v2948_v45 }
 0x6c8   :  { %2949 = vrcp.f32 %v2051_v22 }
 0x6c9   :  { %2951 = vrcp.f32 %v2058_v46 }
 0x6d5   :  { %v2950_v47 = vpop.eup %2949 }
 0x6d6   :  { %v2061_v48 = vmul.f32 %v2950_v47, %v2044_v25  ;;  %v2952_v51 = vpop.eup %2951 }
 0x6d7   :  { %v2064_v52 = vsub.f32 1.0, %v2952_v51  ;;  %v2066_v54 = vmul.f32 %v2952_v51, %v3501_v39 }
 0x6d8   :  { %v2062_v50 = vadd.f32 %v2061_v48, %v1831_v49 }
 0x6da   :  { %2953 = vtanh.f32 %v2062_v50 }
 0x6e7   :  { %v2954_v29 = vpop.eup %2953 }
 0x6e8   :  { %v2065_v53 = vmul.f32 %v2954_v29, %v2064_v52 }
 0x6ea   :  { %v2067_v55 = vadd.f32 %v2066_v54, %v2065_v53 }
 0x6ec   :  { %2436 = vst.msk [vmem:[%s3590_s6 + $0xc] sm:$0x3] %vm562_vm6, %v2067_v55  ;;  %v2076_v56 = vsel %vm2075_vm3, %v2067_v55, %v3501_v39 }
 0x6ed   :  { %2855 = vmatmul.mubr.msk.f32.vlgmr.msra.gmra.mxu0 %vm39_vm0, %v2076_v56  ;;  %2866 = vmatmul.mubr.msk.f32.vlgmr.msra.gmra.mxu1 %vm39_vm0, %v2076_v56 }
 0x6ee   :  { %2869 = vmatpush3.msra.mxu0 %v2966_v57  ;;  %2876 = vmatprep.mubr.msk.f32.mxu0 %vm2993_vm1, %v2992_v14  ;;  %vm2326_vm1 = vcmp.eq.s32.totalorder %v2325_v36, 1 }
 0x6ef   :  { %2870 = vmatprep.subr.mxu0 %v2992_v14 }
 0x6f0   :  { %2871 = vmatpush3.msra.mxu0 %v2967_v27 }
 0x6f1   :  { %2872 = vmatprep.subr.mxu0 %v2992_v14 }
 0x6f2   :  { %2873 = vmatpush3.msra.mxu0 %v2968_v58 }
 0x6f3   :  { %2874 = vmatprep.subr.mxu0 %v2992_v14 }
 0x6f4   :  { %2875 = vmatpush3.msra.mxu0 %v2969_v59 }
 0x6f5   :  { %2877 = vmatmul.mubr.msk.f32.vlgmr.msra.gmra.mxu0 %vm39_vm0, %v2076_v56 }
 0x7ad   :  { %v2154_v60 = vpop.f32.mrf.mxu0  ;;  %v2224_v61 = vpop.f32.mrf.mxu1 }
 0x7ae   :  { %v2298_v62 = vadd.f32 %v2154_v60, %v2078_v12  ;;  %v2305_v4 = vadd.f32 %v2224_v61, %v2080_v2 }
 0x7af   :  { %v2856_v63 = vpop.f32.mrf.mxu0  ;;  %v2867_v0 = vpop.f32.mrf.mxu1 }
 0x7b0   :  { %v2441_v1 = vmul.f32 -1.442695, %v2298_v62  ;;  %v2442_v14 = vmul.f32 -1.442695, %v2305_v4 }
 0x7b2   :  { %2955 = vpow2.f32 %v2441_v1 }
 0x7b3   :  { %2957 = vpow2.f32 %v2442_v14 }
 0x7b5   :  { %v2294_v5 = vpop.f32.mrf.mxu0 }
 0x7b6   :  { %v2295_v11 = vadd.f32 %v3238_v3, %v2294_v5 }
 0x7b7   :  { %v2878_v6 = vpop.f32.mrf.mxu0 }
 0x7bf   :  { %v2956_v7 = vpop.eup %2955 }
 0x7c0   :  { %v2302_v8 = vadd.f32 1.0, %v2956_v7  ;;  %v2958_v9 = vpop.eup %2957 }
 0x7c1   :  { %v2309_v10 = vadd.f32 1.0, %v2958_v9 }
 0x7c2   :  { %2959 = vrcp.f32 %v2302_v8 }
 0x7c3   :  { %2961 = vrcp.f32 %v2309_v10 }
 0x7cf   :  { %v2960_v13 = vpop.eup %2959 }
 0x7d0   :  { %v2312_v16 = vmul.f32 %v2960_v13, %v2295_v11  ;;  %v2962_v31 = vpop.eup %2961 }
 0x7d1   :  { %v2315_v32 = vsub.f32 1.0, %v2962_v31  ;;  %v2317_v35 = vmul.f32 %v2962_v31, %v2076_v56 }
 0x7d2   :  { %v2313_v30 = vadd.f32 %v2312_v16, %v2082_v23 }
 0x7d4   :  { %2963 = vtanh.f32 %v2313_v30 }
 0x7e1   :  { %v2964_v33 = vpop.eup %2963 }
 0x7e2   :  { %v2316_v34 = vmul.f32 %v2964_v33, %v2315_v32 }
 0x7e4   :  { %v2318_v37 = vadd.f32 %v2317_v35, %v2316_v34 }
 0x7e6   :  { %2443 = vst.msk [vmem:[%s3590_s6 + $0xe] sm:$0x3] %vm562_vm6, %v2318_v37  ;;  %v2327_v3 = vsel %vm2326_vm1, %v2318_v37, %v2076_v56 }
 0x7e7   :  { %2328 = vst.msk [vmem:[#allocation5] sm:$0x3] %vm562_vm6, %v2327_v3 }
 0x7e8   :  { %2981 = shalt.err (!%p2978_p4)
}
 0x7e9   :  { %2358 = dma.vmem_to_hbm [thread:$0]  %s2356_s28, 32, %s3591_s7, [#allocation6]   ;;  %v2341_v38 = vpop.permute.xlu1 %2340 }
 0x7ed   :  { %v2330_v39 = vld [vmem:[%s3590_s6 + $0x8] sm:$0xff] }
 0x7ee   :  { %v2344_v40 = vmul.f32 %v2341_v38, %v2330_v39 }
 0x7f0   :  { %2346 = vst.msk [vmem:[%s3590_s6 + $0x8] sm:$0xff] %vm39_vm0, %v2344_v40 }
 0x7f1   :  { %2990 = dma.done.wait [#allocation6], 32  }
 0x7f2   :  { %2991 = vsyncadd [#allocation6], 4294967264 }
 0x7f3   :  { %2364 = vsyncpa [#allocation6], 1 }

</bundles_post_ra>
